<compile_context>
chip_gen: v5e
topology: v5e:2x2
jax: 0.10.0
libtpu: 0.0.40
codegen_flags: <defaults>
</compile_context>

<pallas_src>
import functools
import math

import jax
import jax.numpy as jnp
from jax.experimental import pallas as pl
from jax.experimental.pallas import tpu as pltpu

LANE = 128  # TPU vreg lane width; the channel axis is padded to a multiple of this.


def _round_up(x, m):
    return (x + m - 1) // m * m


def _pick_tile(dim, candidates):
    """Largest candidate tile that evenly divides `dim` (fallback: the full dim)."""
    for c in candidates:
        if dim % c == 0:
            return c
    return dim


# ---------------------------------------------------------------------------
# Kernel 1: tiled MXU matmul (conv via im2col) + fused BN-statistics epilogue
# ---------------------------------------------------------------------------

def _matmul_stats_kernel(a_ref, b_ref, o_ref, stats_ref, acc_ref):
    # grid = (M/tm, N/tn, K/tk); K is the (arbitrary) reduction axis, last.
    k = pl.program_id(2)

    @pl.when(k == 0)
    def _init():
        acc_ref[...] = jnp.zeros_like(acc_ref)

    acc_ref[...] += jnp.dot(a_ref[...], b_ref[...],
                            preferred_element_type=jnp.float32)

    @pl.when(k == pl.num_programs(2) - 1)
    def _epilogue():
        acc = acc_ref[...]
        o_ref[...] = acc.astype(o_ref.dtype)
        s1 = jnp.sum(acc, axis=0, keepdims=True)          # (1, tn)  column sums
        s2 = jnp.sum(acc * acc, axis=0, keepdims=True)    # (1, tn)  column sums of squares
        stats_ref[...] = jnp.concatenate([s1, s2], axis=0)[None]   # (1, 2, tn)


def matmul_with_stats(a, b, *, out_dtype=jnp.bfloat16):
    """(M, K) @ (K, N) on the MXU with bf16 operands / f32 accumulation.

    Returns:
      out   : (M, N) `out_dtype`
      stats : (num_m_blocks, 2, N) f32 partial per-column [sum, sum-of-squares].
    K and N must already be multiples of 128 (channels are carried lane-padded).
    """
    M, K = a.shape
    K2, N = b.shape
    assert K == K2 and K % LANE == 0 and N % LANE == 0

    # Tile sizes: prefer 256-wide M/N tiles (fills the 256-wide v6e/v7x MXU, still
    # a multiple of 128 for v5e); tk is the largest 128-multiple divisor <= 512.
    tm = _pick_tile(_round_up(M, 8), (256, 512, 128, 64, 32, 16, 8))
    Mp = _round_up(M, tm)
    tn = _pick_tile(N, (256, 128))
    tk = _pick_tile(K, (512, 384, 256, 128))

    if Mp != M:  # only when M is not tile-aligned (not hit by the demo shapes)
        a = jnp.zeros((Mp, K), a.dtype).at[:M].set(a)

    gm, gn, gk = Mp // tm, N // tn, K // tk

    out, stats = pl.pallas_call(
        _matmul_stats_kernel,
        grid=(gm, gn, gk),
        in_specs=[
            pl.BlockSpec((tm, tk), lambda i, j, k: (i, k)),
            pl.BlockSpec((tk, tn), lambda i, j, k: (k, j)),
        ],
        out_specs=(
            pl.BlockSpec((tm, tn), lambda i, j, k: (i, j)),
            pl.BlockSpec((1, 2, tn), lambda i, j, k: (i, 0, j)),
        ),
        out_shape=(
            jax.ShapeDtypeStruct((Mp, N), out_dtype),
            jax.ShapeDtypeStruct((gm, 2, N), jnp.float32),
        ),
        scratch_shapes=[pltpu.VMEM((tm, tn), jnp.float32)],
        compiler_params=pltpu.CompilerParams(
            dimension_semantics=("parallel", "parallel", "arbitrary")),
    )(a, b)

    if Mp != M:
        out = out[:M]
    return out, stats


# ---------------------------------------------------------------------------
# Kernel 2: fused BatchNorm-apply (+ optional downsample-BN + residual) (+ ReLU)
# ---------------------------------------------------------------------------

def _bn_act_kernel(x_ref, scale_ref, shift_ref, o_ref, *, relu):
    y = x_ref[...].astype(jnp.float32) * scale_ref[...] + shift_ref[...]
    if relu:
        y = jnp.maximum(y, 0.0)
    o_ref[...] = y.astype(o_ref.dtype)


def _bn_add_relu_kernel(x_ref, scale_ref, shift_ref, res_ref, o_ref):
    y = x_ref[...].astype(jnp.float32) * scale_ref[...] + shift_ref[...]
    y = y + res_ref[...].astype(jnp.float32)
    o_ref[...] = jnp.maximum(y, 0.0).astype(o_ref.dtype)


def _bn_bn_add_relu_kernel(x_ref, s1_ref, b1_ref, res_ref, s2_ref, b2_ref, o_ref):
    y = x_ref[...].astype(jnp.float32) * s1_ref[...] + b1_ref[...]
    r = res_ref[...].astype(jnp.float32) * s2_ref[...] + b2_ref[...]
    o_ref[...] = jnp.maximum(y + r, 0.0).astype(o_ref.dtype)


def bn_apply(x, scale, shift, *, residual=None, res_scale=None, res_shift=None,
             relu=True, out_dtype=jnp.bfloat16):
    """Row-tiled elementwise BN affine (+residual)(+ReLU). x: (R, C) with C%128==0."""
    R, C = x.shape
    tr = _pick_tile(R, (512, 256, 128, 64, 32, 16, 8))
    grid = (R // tr,)
    row = pl.BlockSpec((tr, C), lambda i: (i, 0))
    vec = pl.BlockSpec((1, C), lambda i: (0, 0))
    out_shape = jax.ShapeDtypeStruct((R, C), out_dtype)
    cp = pltpu.CompilerParams(dimension_semantics=("parallel",))

    if residual is None:
        return pl.pallas_call(
            functools.partial(_bn_act_kernel, relu=relu),
            grid=grid, in_specs=[row, vec, vec], out_specs=row,
            out_shape=out_shape, compiler_params=cp,
        )(x, scale, shift)
    if res_scale is None:
        return pl.pallas_call(
            _bn_add_relu_kernel,
            grid=grid, in_specs=[row, vec, vec, row], out_specs=row,
            out_shape=out_shape, compiler_params=cp,
        )(x, scale, shift, residual)
    return pl.pallas_call(
        _bn_bn_add_relu_kernel,
        grid=grid, in_specs=[row, vec, vec, row, vec, vec], out_specs=row,
        out_shape=out_shape, compiler_params=cp,
    )(x, scale, shift, residual, res_scale, res_shift)


# ---------------------------------------------------------------------------
# Plain-JAX glue: im2col, BN scale/shift from fused stats
# ---------------------------------------------------------------------------

def _im2col_3x3(x_nhwc, stride):
    """3x3 / pad=1 conv patches.  `stride` is a static Python int."""
    N, H, W, C = x_nhwc.shape
    OH = (H + 2 - 3) // stride + 1
    OW = (W + 2 - 3) // stride + 1
    xp = jnp.pad(x_nhwc, ((0, 0), (1, 1), (1, 1), (0, 0)))
    cols = []
    for i in range(3):
        for j in range(3):
            cols.append(xp[:, i:i + (OH - 1) * stride + 1:stride,
                           j:j + (OW - 1) * stride + 1:stride, :])
    patches = jnp.stack(cols, axis=3)                    # (N, OH, OW, 9, C)
    return patches.reshape(N * OH * OW, 9 * C), (N, OH, OW)


def conv3x3_with_stats(x_nhwc, w_mat, stride):
    a, dims = _im2col_3x3(x_nhwc, stride)
    out, stats = matmul_with_stats(a, w_mat)
    return out, stats, dims


def conv1x1_with_stats(x_nhwc, w_mat, stride):
    xs = x_nhwc[:, ::stride, ::stride, :]
    N, OH, OW, C = xs.shape
    out, stats = matmul_with_stats(xs.reshape(N * OH * OW, C), w_mat)
    return out, stats, (N, OH, OW)


def _bn_scale_shift(stats, gamma, beta, count, eps=1e-5):
    """Reduce the per-M-block partial stats and fold BN into a scale/shift pair."""
    s = jnp.sum(stats[:, 0, :], axis=0)
    s2 = jnp.sum(stats[:, 1, :], axis=0)
    mean = s / count
    var = jnp.maximum(s2 / count - mean * mean, 0.0)      # biased var (PyTorch train)
    scale = gamma * jax.lax.rsqrt(var + eps)
    shift = beta - mean * scale
    return scale[None, :], shift[None, :]


# ---------------------------------------------------------------------------
# BasicBlock forward
# ---------------------------------------------------------------------------

def basic_block_forward(params, x_nchw, *, stride, planes, eps=1e-5):
    """BasicBlock forward (attention_type='ir' => identity).  Input/output NCHW f32."""
    N, Cin, H, W = x_nchw.shape
    cin_p = params["w1"].shape[0] // 9
    cout_p = params["w1"].shape[1]

    # NCHW -> NHWC, bf16 matmul operands, channels lane-padded once.
    x = jnp.transpose(x_nchw, (0, 2, 3, 1)).astype(jnp.bfloat16)
    if cin_p != Cin:
        x = jnp.pad(x, ((0, 0), (0, 0), (0, 0), (0, cin_p - Cin)))

    # conv1 (3x3, stride) with fused BN1 statistics
    out1, st1, (n, oh, ow) = conv3x3_with_stats(x, params["w1"], stride)
    cnt = n * oh * ow
    sc1, sh1 = _bn_scale_shift(st1, params["bn1_g"], params["bn1_b"], cnt, eps)
    h1 = bn_apply(out1, sc1, sh1, relu=True)             # (cnt, cout_p) bf16

    # conv2 (3x3, stride 1) with fused BN2 statistics
    out2, st2, _ = conv3x3_with_stats(h1.reshape(n, oh, ow, cout_p), params["w2"], 1)
    sc2, sh2 = _bn_scale_shift(st2, params["bn2_g"], params["bn2_b"], cnt, eps)

    if "ds_w" in params:
        # downsample: 1x1 conv (stride) + BN, fused with bn2 + add + relu.
        dso, dst, (dn, dh, dw) = conv1x1_with_stats(x, params["ds_w"], stride)
        assert dn * dh * dw == cnt
        scd, shd = _bn_scale_shift(dst, params["ds_g"], params["ds_b"], cnt, eps)
        y = bn_apply(out2, sc2, sh2, residual=dso,
                     res_scale=scd, res_shift=shd, relu=True)
    else:
        assert stride == 1 and cin_p == cout_p
        y = bn_apply(out2, sc2, sh2, residual=x.reshape(N * H * W, cin_p), relu=True)

    y = y.reshape(n, oh, ow, cout_p)[..., :planes].astype(jnp.float32)
    return jnp.transpose(y, (0, 3, 1, 2))                # back to NCHW


# ---------------------------------------------------------------------------
# Parameters (PyTorch-layout weights -> padded matmul matrices) + f32 reference
# ---------------------------------------------------------------------------

def make_block_params(key, inplanes, planes, stride):
    cin_p = _round_up(inplanes, LANE)
    cout_p = _round_up(planes, LANE)
    keys = jax.random.split(key, 3)

    def conv_w(k, cout, cin, kh, kw):
        std = math.sqrt(2.0 / (cout * kh * kw))
        w = std * jax.random.normal(k, (cout, cin, kh, kw), jnp.float32)
        return w.astype(jnp.bfloat16).astype(jnp.float32)   # match kernel rounding

    def to_matmul(w, cinp, coutp):
        cout, cin, kh, kw = w.shape
        wp = jnp.zeros((coutp, cinp, kh, kw), jnp.float32).at[:cout, :cin].set(w)
        return jnp.transpose(wp, (2, 3, 1, 0)).reshape(kh * kw * cinp, coutp).astype(jnp.bfloat16)

    w1 = conv_w(keys[0], planes, inplanes, 3, 3)
    w2 = conv_w(keys[1], planes, planes, 3, 3)
    params = {
        "w1": to_matmul(w1, cin_p, cout_p),
        "bn1_g": jnp.ones((cout_p,), jnp.float32),
        "bn1_b": jnp.zeros((cout_p,), jnp.float32),
        "w2": to_matmul(w2, cout_p, cout_p),
        "bn2_g": jnp.ones((cout_p,), jnp.float32),
        "bn2_b": jnp.zeros((cout_p,), jnp.float32),
    }
    raw = {"w1": w1, "g1": jnp.ones((planes,)), "b1": jnp.zeros((planes,)),
           "w2": w2, "g2": jnp.ones((planes,)), "b2": jnp.zeros((planes,))}
    if stride != 1 or inplanes != planes:
        wd = conv_w(keys[2], planes, inplanes, 1, 1)
        params["ds_w"] = to_matmul(wd, cin_p, cout_p)
        params["ds_g"] = jnp.ones((cout_p,), jnp.float32)
        params["ds_b"] = jnp.zeros((cout_p,), jnp.float32)
        raw.update({"wd": wd, "gd": jnp.ones((planes,)), "bd": jnp.zeros((planes,))})
    return params, raw


def reference_block(raw, x, stride, eps=1e-5):
    """Plain-JAX f32 reference of the PyTorch BasicBlock forward (training-mode BN)."""
    def conv(x, w, s, p):
        return jax.lax.conv_general_dilated(
            x, w, (s, s), [(p, p), (p, p)],
            dimension_numbers=("NCHW", "OIHW", "NCHW"))

    def bn(x, g, b):
        mean = x.mean(axis=(0, 2, 3), keepdims=True)
        var = x.var(axis=(0, 2, 3), keepdims=True)
        xh = (x - mean) * jax.lax.rsqrt(var + eps)
        return xh * g[None, :, None, None] + b[None, :, None, None]

    out = jax.nn.relu(bn(conv(x, raw["w1"], stride, 1), raw["g1"], raw["b1"]))
    out = bn(conv(out, raw["w2"], 1, 1), raw["g2"], raw["b2"])
    residual = x
    if "wd" in raw:
        residual = bn(conv(x, raw["wd"], stride, 0), raw["gd"], raw["bd"])
    return jax.nn.relu(out + residual)


if __name__ == "__main__":
    key = jax.random.PRNGKey(0)
    k1, k2, kx = jax.random.split(key, 3)

    x = jax.random.normal(kx, (2, 64, 16, 16), jnp.float32)      # NCHW, like PyTorch
    x_ref = x.astype(jnp.bfloat16).astype(jnp.float32)           # same input rounding

    # Block A: inplanes == planes, stride 1, no downsample (default BasicBlock args).
    pA, rawA = make_block_params(k1, 64, 64, 1)
    fwdA = jax.jit(functools.partial(basic_block_forward, stride=1, planes=64))
    yA = fwdA(pA, x)
    jax.block_until_ready(yA)
    assert yA.shape == (2, 64, 16, 16)
    refA = reference_block(rawA, x_ref, 1)
    assert float(jnp.max(jnp.abs(yA - refA))) < 0.15

    # Block B: channel expansion + stride 2 with 1x1-conv downsample path.
    pB, rawB = make_block_params(k2, 64, 128, 2)
    fwdB = jax.jit(functools.partial(basic_block_forward, stride=2, planes=128))
    yB = fwdB(pB, x)
    jax.block_until_ready(yB)
    assert yB.shape == (2, 128, 8, 8)
    refB = reference_block(rawB, x_ref, 2)
    assert float(jnp.max(jnp.abs(yB - refB))) < 0.15

    print("KERNEL_OK")
</pallas_src>

<mosaic_0001>
module attributes {stable_mosaic.version = 11 : i64} {
  func.func @_matmul_stats_kernel(%arg0: i32, %arg1: i32, %arg2: i32, %arg3: memref<256x384xbf16, #tpu.memory_space<vmem>>, %arg4: memref<384x128xbf16, #tpu.memory_space<vmem>>, %arg5: memref<256x128xbf16, #tpu.memory_space<vmem>>, %arg6: memref<1x2x128xf32, #tpu.memory_space<vmem>>, %arg7: memref<256x128xf32, #tpu.memory_space<vmem>>) attributes {dimension_semantics = [#tpu.dimension_semantics<parallel>, #tpu.dimension_semantics<parallel>, #tpu.dimension_semantics<arbitrary>], iteration_bounds = array<i64: 2, 1, 3>, scalar_prefetch = 0 : i64, scratch_operands = 1 : i64, tpu.core_type = #tpu.core_type<tc>, window_params = [{transform_indices = @transform_0, window_bounds = array<i64: 256, 384>}, {transform_indices = @transform_1, window_bounds = array<i64: 384, 128>}, {transform_indices = @transform_2, window_bounds = array<i64: 256, 128>}, {transform_indices = @transform_3, window_bounds = array<i64: 1, 2, 128>}]} {
    %c0_i32 = arith.constant 0 : i32
    %0 = arith.cmpi eq, %arg2, %c0_i32 : i32
    %1 = arith.extui %0 : i1 to i32
    %c0_i32_0 = arith.constant 0 : i32
    %2 = arith.cmpi ne, %1, %c0_i32_0 : i32
    scf.if %2 {
      %cst_9 = arith.constant 0.000000e+00 : f32
      %12 = vector.broadcast %cst_9 : f32 to vector<256x128xf32>
      %c0_10 = arith.constant 0 : index
      %c0_11 = arith.constant 0 : index
      %13 = vector.load %arg7[%c0_10, %c0_11] : memref<256x128xf32, #tpu.memory_space<vmem>>, vector<256x128xf32>
      tpu.vector_store %arg7[%c0_10, %c0_11], %12 {strides = array<i32>} : memref<256x128xf32, #tpu.memory_space<vmem>>, vector<256x128xf32>,
    } else {
    }
    %c0 = arith.constant 0 : index
    %c0_1 = arith.constant 0 : index
    %3 = vector.load %arg7[%c0, %c0_1] : memref<256x128xf32, #tpu.memory_space<vmem>>, vector<256x128xf32>
    %c0_2 = arith.constant 0 : index
    %c0_3 = arith.constant 0 : index
    %4 = vector.load %arg3[%c0_2, %c0_3] : memref<256x384xbf16, #tpu.memory_space<vmem>>, vector<256x384xbf16>
    %c0_4 = arith.constant 0 : index
    %c0_5 = arith.constant 0 : index
    %5 = vector.load %arg4[%c0_4, %c0_5] : memref<384x128xbf16, #tpu.memory_space<vmem>>, vector<384x128xbf16>
    %cst = arith.constant dense<0.000000e+00> : vector<256x128xf32>
    %6 = tpu.matmul %4, %5, %cst {dimension_numbers = #tpu.dot_dimension_numbers<[1], [0], [0], [1], [0, 0, 1, 1], [], []>} : vector<256x384xbf16>, vector<384x128xbf16>, vector<256x128xf32> -> vector<256x128xf32>
    %7 = arith.addf %3, %6 : vector<256x128xf32>
    %c0_6 = arith.constant 0 : index
    %c0_7 = arith.constant 0 : index
    %8 = vector.load %arg7[%c0_6, %c0_7] : memref<256x128xf32, #tpu.memory_space<vmem>>, vector<256x128xf32>
    tpu.vector_store %arg7[%c0_6, %c0_7], %7 {strides = array<i32>} : memref<256x128xf32, #tpu.memory_space<vmem>>, vector<256x128xf32>,
    %c2_i32 = arith.constant 2 : i32
    %9 = arith.cmpi eq, %arg2, %c2_i32 : i32
    %10 = arith.extui %9 : i1 to i32
    %c0_i32_8 = arith.constant 0 : i32
    %11 = arith.cmpi ne, %10, %c0_i32_8 : i32
    scf.if %11 {
      %c0_9 = arith.constant 0 : index
      %c0_10 = arith.constant 0 : index
      %12 = vector.load %arg7[%c0_9, %c0_10] : memref<256x128xf32, #tpu.memory_space<vmem>>, vector<256x128xf32>
      %13 = arith.truncf %12 : vector<256x128xf32> to vector<256x128xbf16>
      %c0_11 = arith.constant 0 : index
      %c0_12 = arith.constant 0 : index
      %14 = vector.load %arg5[%c0_11, %c0_12] : memref<256x128xbf16, #tpu.memory_space<vmem>>, vector<256x128xbf16>
      tpu.vector_store %arg5[%c0_11, %c0_12], %13 {strides = array<i32>} : memref<256x128xbf16, #tpu.memory_space<vmem>>, vector<256x128xbf16>,
      %cst_13 = arith.constant dense<0.000000e+00> : vector<128xf32>
      %15 = vector.multi_reduction <add>, %12, %cst_13 [0] : vector<256x128xf32> to vector<128xf32>
      %16 = vector.shape_cast %15 : vector<128xf32> to vector<1x128xf32>
      %17 = arith.mulf %12, %12 : vector<256x128xf32>
      %cst_14 = arith.constant dense<0.000000e+00> : vector<128xf32>
      %18 = vector.multi_reduction <add>, %17, %cst_14 [0] : vector<256x128xf32> to vector<128xf32>
      %19 = vector.shape_cast %18 : vector<128xf32> to vector<1x128xf32>
      %20 = tpu.concatenate %16, %19 in 0 : vector<1x128xf32>, vector<1x128xf32> -> vector<2x128xf32>
      %21 = vector.shape_cast %20 : vector<2x128xf32> to vector<1x2x128xf32>
      %c0_15 = arith.constant 0 : index
      %c0_16 = arith.constant 0 : index
      %c0_17 = arith.constant 0 : index
      %22 = vector.load %arg6[%c0_15, %c0_16, %c0_17] : memref<1x2x128xf32, #tpu.memory_space<vmem>>, vector<1x2x128xf32>
      tpu.vector_store %arg6[%c0_15, %c0_16, %c0_17], %21 {strides = array<i32>} : memref<1x2x128xf32, #tpu.memory_space<vmem>>, vector<1x2x128xf32>,
    } else {
    }
    return
  }
  func.func @transform_0(%arg0: i32, %arg1: i32, %arg2: i32) -> (i32, i32) {
    %c0_i32 = arith.constant 0 : i32
    return %arg0, %arg2 : i32, i32
  }
  func.func @transform_1(%arg0: i32, %arg1: i32, %arg2: i32) -> (i32, i32) {
    %c0_i32 = arith.constant 0 : i32
    return %arg2, %arg1 : i32, i32
  }
  func.func @transform_2(%arg0: i32, %arg1: i32, %arg2: i32) -> (i32, i32) {
    %c0_i32 = arith.constant 0 : i32
    return %arg0, %arg1 : i32, i32
  }
  func.func @transform_3(%arg0: i32, %arg1: i32, %arg2: i32) -> (i32, i32, i32) {
    %c0_i32 = arith.constant 0 : i32
    %c0_i32_0 = arith.constant 0 : i32
    return %arg0, %c0_i32, %arg1 : i32, i32, i32
  }
}

module attributes {stable_mosaic.version = 11 : i64} {
  func.func @_bn_act_kernel(%arg0: i32, %arg1: memref<512x128xbf16, #tpu.memory_space<vmem>>, %arg2: memref<1x128xf32, #tpu.memory_space<vmem>>, %arg3: memref<1x128xf32, #tpu.memory_space<vmem>>, %arg4: memref<512x128xbf16, #tpu.memory_space<vmem>>) attributes {dimension_semantics = [#tpu.dimension_semantics<parallel>], iteration_bounds = array<i64: 1>, scalar_prefetch = 0 : i64, scratch_operands = 0 : i64, tpu.core_type = #tpu.core_type<tc>, window_params = [{transform_indices = @transform_0, window_bounds = array<i64: 512, 128>}, {pipeline_mode = #tpu.pipeline_mode<synchronous>, transform_indices = @transform_1, window_bounds = array<i64: 1, 128>}, {pipeline_mode = #tpu.pipeline_mode<synchronous>, transform_indices = @transform_2, window_bounds = array<i64: 1, 128>}, {transform_indices = @transform_3, window_bounds = array<i64: 512, 128>}]} {
    %c0 = arith.constant 0 : index
    %c0_0 = arith.constant 0 : index
    %0 = vector.load %arg1[%c0, %c0_0] : memref<512x128xbf16, #tpu.memory_space<vmem>>, vector<512x128xbf16>
    %1 = arith.extf %0 : vector<512x128xbf16> to vector<512x128xf32>
    %c0_1 = arith.constant 0 : index
    %c0_2 = arith.constant 0 : index
    %2 = vector.load %arg2[%c0_1, %c0_2] : memref<1x128xf32, #tpu.memory_space<vmem>>, vector<1x128xf32>
    %3 = vector.broadcast %2 : vector<1x128xf32> to vector<512x128xf32>
    %4 = arith.mulf %1, %3 : vector<512x128xf32>
    %c0_3 = arith.constant 0 : index
    %c0_4 = arith.constant 0 : index
    %5 = vector.load %arg3[%c0_3, %c0_4] : memref<1x128xf32, #tpu.memory_space<vmem>>, vector<1x128xf32>
    %6 = vector.broadcast %5 : vector<1x128xf32> to vector<512x128xf32>
    %7 = arith.addf %4, %6 : vector<512x128xf32>
    %cst = arith.constant 0.000000e+00 : f32
    %8 = vector.broadcast %cst : f32 to vector<512x128xf32>
    %9 = arith.maximumf %7, %8 : vector<512x128xf32>
    %10 = arith.truncf %9 : vector<512x128xf32> to vector<512x128xbf16>
    %c0_5 = arith.constant 0 : index
    %c0_6 = arith.constant 0 : index
    %11 = vector.load %arg4[%c0_5, %c0_6] : memref<512x128xbf16, #tpu.memory_space<vmem>>, vector<512x128xbf16>
    tpu.vector_store %arg4[%c0_5, %c0_6], %10 {strides = array<i32>} : memref<512x128xbf16, #tpu.memory_space<vmem>>, vector<512x128xbf16>,
    return
  }
  func.func @transform_0(%arg0: i32) -> (i32, i32) {
    %c0_i32 = arith.constant 0 : i32
    %c0_i32_0 = arith.constant 0 : i32
    return %arg0, %c0_i32 : i32, i32
  }
  func.func @transform_1(%arg0: i32) -> (i32, i32) {
    %c0_i32 = arith.constant 0 : i32
    %c0_i32_0 = arith.constant 0 : i32
    %c0_i32_1 = arith.constant 0 : i32
    return %c0_i32, %c0_i32_0 : i32, i32
  }
  func.func @transform_2(%arg0: i32) -> (i32, i32) {
    %c0_i32 = arith.constant 0 : i32
    %c0_i32_0 = arith.constant 0 : i32
    %c0_i32_1 = arith.constant 0 : i32
    return %c0_i32, %c0_i32_0 : i32, i32
  }
  func.func @transform_3(%arg0: i32) -> (i32, i32) {
    %c0_i32 = arith.constant 0 : i32
    %c0_i32_0 = arith.constant 0 : i32
    return %arg0, %c0_i32 : i32, i32
  }
}

module attributes {stable_mosaic.version = 11 : i64} {
  func.func @_bn_add_relu_kernel(%arg0: i32, %arg1: memref<512x128xbf16, #tpu.memory_space<vmem>>, %arg2: memref<1x128xf32, #tpu.memory_space<vmem>>, %arg3: memref<1x128xf32, #tpu.memory_space<vmem>>, %arg4: memref<512x128xbf16, #tpu.memory_space<vmem>>, %arg5: memref<512x128xbf16, #tpu.memory_space<vmem>>) attributes {dimension_semantics = [#tpu.dimension_semantics<parallel>], iteration_bounds = array<i64: 1>, scalar_prefetch = 0 : i64, scratch_operands = 0 : i64, tpu.core_type = #tpu.core_type<tc>, window_params = [{transform_indices = @transform_0, window_bounds = array<i64: 512, 128>}, {pipeline_mode = #tpu.pipeline_mode<synchronous>, transform_indices = @transform_1, window_bounds = array<i64: 1, 128>}, {pipeline_mode = #tpu.pipeline_mode<synchronous>, transform_indices = @transform_2, window_bounds = array<i64: 1, 128>}, {transform_indices = @transform_3, window_bounds = array<i64: 512, 128>}, {transform_indices = @transform_4, window_bounds = array<i64: 512, 128>}]} {
    %c0 = arith.constant 0 : index
    %c0_0 = arith.constant 0 : index
    %0 = vector.load %arg1[%c0, %c0_0] : memref<512x128xbf16, #tpu.memory_space<vmem>>, vector<512x128xbf16>
    %1 = arith.extf %0 : vector<512x128xbf16> to vector<512x128xf32>
    %c0_1 = arith.constant 0 : index
    %c0_2 = arith.constant 0 : index
    %2 = vector.load %arg2[%c0_1, %c0_2] : memref<1x128xf32, #tpu.memory_space<vmem>>, vector<1x128xf32>
    %3 = vector.broadcast %2 : vector<1x128xf32> to vector<512x128xf32>
    %4 = arith.mulf %1, %3 : vector<512x128xf32>
    %c0_3 = arith.constant 0 : index
    %c0_4 = arith.constant 0 : index
    %5 = vector.load %arg3[%c0_3, %c0_4] : memref<1x128xf32, #tpu.memory_space<vmem>>, vector<1x128xf32>
    %6 = vector.broadcast %5 : vector<1x128xf32> to vector<512x128xf32>
    %7 = arith.addf %4, %6 : vector<512x128xf32>
    %c0_5 = arith.constant 0 : index
    %c0_6 = arith.constant 0 : index
    %8 = vector.load %arg4[%c0_5, %c0_6] : memref<512x128xbf16, #tpu.memory_space<vmem>>, vector<512x128xbf16>
    %9 = arith.extf %8 : vector<512x128xbf16> to vector<512x128xf32>
    %10 = arith.addf %7, %9 : vector<512x128xf32>
    %cst = arith.constant 0.000000e+00 : f32
    %11 = vector.broadcast %cst : f32 to vector<512x128xf32>
    %12 = arith.maximumf %10, %11 : vector<512x128xf32>
    %13 = arith.truncf %12 : vector<512x128xf32> to vector<512x128xbf16>
    %c0_7 = arith.constant 0 : index
    %c0_8 = arith.constant 0 : index
    %14 = vector.load %arg5[%c0_7, %c0_8] : memref<512x128xbf16, #tpu.memory_space<vmem>>, vector<512x128xbf16>
    tpu.vector_store %arg5[%c0_7, %c0_8], %13 {strides = array<i32>} : memref<512x128xbf16, #tpu.memory_space<vmem>>, vector<512x128xbf16>,
    return
  }
  func.func @transform_0(%arg0: i32) -> (i32, i32) {
    %c0_i32 = arith.constant 0 : i32
    %c0_i32_0 = arith.constant 0 : i32
    return %arg0, %c0_i32 : i32, i32
  }
  func.func @transform_1(%arg0: i32) -> (i32, i32) {
    %c0_i32 = arith.constant 0 : i32
    %c0_i32_0 = arith.constant 0 : i32
    %c0_i32_1 = arith.constant 0 : i32
    return %c0_i32, %c0_i32_0 : i32, i32
  }
  func.func @transform_2(%arg0: i32) -> (i32, i32) {
    %c0_i32 = arith.constant 0 : i32
    %c0_i32_0 = arith.constant 0 : i32
    %c0_i32_1 = arith.constant 0 : i32
    return %c0_i32, %c0_i32_0 : i32, i32
  }
  func.func @transform_3(%arg0: i32) -> (i32, i32) {
    %c0_i32 = arith.constant 0 : i32
    %c0_i32_0 = arith.constant 0 : i32
    return %arg0, %c0_i32 : i32, i32
  }
  func.func @transform_4(%arg0: i32) -> (i32, i32) {
    %c0_i32 = arith.constant 0 : i32
    %c0_i32_0 = arith.constant 0 : i32
    return %arg0, %c0_i32 : i32, i32
  }
}

</mosaic_0001>

<bundles_post_ra>
// kernel: basic_block_forward.5
= control target key start
LH: loop header
LB: loop body
LE: loop exit
PB: predicated region body
PF: predicated region fallthrough
CT: control target
= control target key end

     0   :  { %s1176_s0 = inlined_call_operand.vmem [shape: bf16[512,128], index: 0, kind: input, shape index: {}]   ;;  %s1177_s1 = inlined_call_operand.vmem [shape: f32[1,128], index: 1, kind: input, shape index: {}]   ;;  %s1178_s2 = inlined_call_operand.vmem [shape: f32[1,128], index: 2, kind: input, shape index: {}]   ;;  %s1179_s3 = inlined_call_operand.vmem [shape: bf16[512,128], index: 3, kind: output, shape index: {}]  }
   0x1   :  { %v475_v0 = vld [vmem:[%s1176_s0] sm:$0xff]   ;;  %v762_v5 = vld [vmem:[%s1176_s0 + $0x8] sm:$0xff]   ;;  %v763_v8 = vld [vmem:[%s1176_s0 + $0x10] sm:$0xff]  }
   0x2   :  { %v852_v1 = vld [vmem:[%s1177_s1] ss:$0 sm:$0xff]  ;;  %v476_v2 = vunpack.c.l.bf16 %v475_v0  ;;  %v477_v3 = vunpack.c.h.bf16 %v475_v0  ;;  %v480_v6 = vunpack.c.l.bf16 %v762_v5  ;;  %v481_v7 = vunpack.c.h.bf16 %v762_v5  ;;  %v764_v9 = vld [vmem:[%s1176_s0 + $0x18] sm:$0xff]   ;;  %v766_v35 = vld [vmem:[%s1176_s0 + $0x28] sm:$0xff]  }
   0x3   :  { %v857_v4 = vld [vmem:[%s1178_s2] ss:$0 sm:$0xff]  ;;  %v484_v12 = vunpack.c.l.bf16 %v763_v8  ;;  %v485_v13 = vunpack.c.h.bf16 %v763_v8  ;;  %v488_v16 = vunpack.c.l.bf16 %v764_v9  ;;  %v489_v17 = vunpack.c.h.bf16 %v764_v9  ;;  %v767_v40 = vld [vmem:[%s1176_s0 + $0x30] sm:$0xff]   ;;  %v768_v45 = vld [vmem:[%s1176_s0 + $0x38] sm:$0xff]  }
   0x4   :  { %v146_v10 = vmul.f32 %v852_v1, %v476_v2  ;;  %v147_v11 = vmul.f32 %v852_v1, %v477_v3  ;;  %v148_v14 = vmul.f32 %v852_v1, %v480_v6  ;;  %v149_v15 = vmul.f32 %v852_v1, %v481_v7  ;;  %v765_v26 = vld [vmem:[%s1176_s0 + $0x20] sm:$0xff]  }
   0x5   :  { %v150_v20 = vmul.f32 %v852_v1, %v484_v12  ;;  %v151_v21 = vmul.f32 %v852_v1, %v485_v13  ;;  %v152_v24 = vmul.f32 %v852_v1, %v488_v16  ;;  %v153_v25 = vmul.f32 %v852_v1, %v489_v17  ;;  %v769_v62 = vld [vmem:[%s1176_s0 + $0x40] sm:$0xff]   ;;  %v770_v13 = vld [vmem:[%s1176_s0 + $0x48] sm:$0xff]  }
   0x6   :  { %v214_v18 = vadd.f32 %v857_v4, %v146_v10  ;;  %v215_v19 = vadd.f32 %v857_v4, %v147_v11  ;;  %v216_v22 = vadd.f32 %v857_v4, %v148_v14  ;;  %v217_v23 = vadd.f32 %v857_v4, %v149_v15 }
   0x7   :  { %v218_v29 = vadd.f32 %v857_v4, %v150_v20  ;;  %v219_v30 = vadd.f32 %v857_v4, %v151_v21  ;;  %v220_v33 = vadd.f32 %v857_v4, %v152_v24  ;;  %v221_v34 = vadd.f32 %v857_v4, %v153_v25 }
   0x8   :  { %v278_v27 = vmax.f32 %v214_v18, 0.0  ;;  %v279_v28 = vmax.f32 %v215_v19, 0.0  ;;  %v280_v31 = vmax.f32 %v216_v22, 0.0  ;;  %v281_v32 = vmax.f32 %v217_v23, 0.0  ;;  %v771_v18 = vld [vmem:[%s1176_s0 + $0x50] sm:$0xff]   ;;  %v772_v23 = vld [vmem:[%s1176_s0 + $0x58] sm:$0xff]  }
   0x9   :  { %v282_v37 = vmax.f32 %v218_v29, 0.0  ;;  %v283_v38 = vmax.f32 %v219_v30, 0.0  ;;  %v492_v39 = vunpack.c.l.bf16 %v765_v26  ;;  %v284_v42 = vmax.f32 %v220_v33, 0.0 }
   0xa   :  { %v605_v36 = vpack.c.bf16 %v279_v28, %v278_v27  ;;  %v610_v41 = vpack.c.bf16 %v281_v32, %v280_v31  ;;  %v285_v43 = vmax.f32 %v221_v34, 0.0  ;;  %v493_v44 = vunpack.c.h.bf16 %v765_v26 }
   0xb   :  { %v615_v46 = vpack.c.bf16 %v283_v38, %v282_v37  ;;  %v154_v47 = vmul.f32 %v852_v1, %v492_v39  ;;  %v496_v48 = vunpack.c.l.bf16 %v766_v35  ;;  %v497_v49 = vunpack.c.h.bf16 %v766_v35 }
   0xc   :  { %606 = vst [vmem:[%s1179_s3] sm:$0xff] %v605_v36   ;;  %v620_v50 = vpack.c.bf16 %v285_v43, %v284_v42  ;;  %v155_v51 = vmul.f32 %v852_v1, %v493_v44  ;;  %v500_v52 = vunpack.c.l.bf16 %v767_v40  ;;  %v501_v53 = vunpack.c.h.bf16 %v767_v40  ;;  %v773_v36 = vld [vmem:[%s1176_s0 + $0x60] sm:$0xff]  }
   0xd   :  { %793 = vst [vmem:[%s1179_s3 + $0x8] sm:$0xff] %v610_v41   ;;  %v222_v54 = vadd.f32 %v857_v4, %v154_v47  ;;  %v156_v55 = vmul.f32 %v852_v1, %v496_v48  ;;  %v157_v56 = vmul.f32 %v852_v1, %v497_v49  ;;  %v504_v57 = vunpack.c.l.bf16 %v768_v45 }
   0xe   :  { %794 = vst [vmem:[%s1179_s3 + $0x10] sm:$0xff] %v615_v46   ;;  %v223_v58 = vadd.f32 %v857_v4, %v155_v51  ;;  %v158_v59 = vmul.f32 %v852_v1, %v500_v52  ;;  %v159_v60 = vmul.f32 %v852_v1, %v501_v53  ;;  %v505_v61 = vunpack.c.h.bf16 %v768_v45  ;;  %v774_v53 = vld [vmem:[%s1176_s0 + $0x68] sm:$0xff]  }
   0xf   :  { %795 = vst [vmem:[%s1179_s3 + $0x18] sm:$0xff] %v620_v50   ;;  %v286_v63 = vmax.f32 %v222_v54, 0.0  ;;  %v224_v0 = vadd.f32 %v857_v4, %v156_v55  ;;  %v225_v2 = vadd.f32 %v857_v4, %v157_v56  ;;  %v160_v3 = vmul.f32 %v852_v1, %v504_v57 }
  0x10   :  { %v287_v5 = vmax.f32 %v223_v58, 0.0  ;;  %v226_v6 = vadd.f32 %v857_v4, %v158_v59  ;;  %v227_v7 = vadd.f32 %v857_v4, %v159_v60  ;;  %v161_v8 = vmul.f32 %v852_v1, %v505_v61  ;;  %v775_v58 = vld [vmem:[%s1176_s0 + $0x70] sm:$0xff]  }
  0x11   :  { %v288_v9 = vmax.f32 %v224_v0, 0.0  ;;  %v289_v10 = vmax.f32 %v225_v2, 0.0  ;;  %v228_v11 = vadd.f32 %v857_v4, %v160_v3  ;;  %v508_v12 = vunpack.c.l.bf16 %v769_v62 }
  0x12   :  { %v625_v14 = vpack.c.bf16 %v287_v5, %v286_v63  ;;  %v290_v15 = vmax.f32 %v226_v6, 0.0  ;;  %v291_v16 = vmax.f32 %v227_v7, 0.0  ;;  %v229_v17 = vadd.f32 %v857_v4, %v161_v8  ;;  %v776_v63 = vld [vmem:[%s1176_s0 + $0x78] sm:$0xff]  }
  0x13   :  { %v630_v19 = vpack.c.bf16 %v289_v10, %v288_v9  ;;  %v292_v20 = vmax.f32 %v228_v11, 0.0  ;;  %v509_v21 = vunpack.c.h.bf16 %v769_v62  ;;  %v162_v22 = vmul.f32 %v852_v1, %v508_v12 }
  0x14   :  { %796 = vst [vmem:[%s1179_s3 + $0x20] sm:$0xff] %v625_v14   ;;  %v635_v24 = vpack.c.bf16 %v291_v16, %v290_v15  ;;  %v293_v25 = vmax.f32 %v229_v17, 0.0  ;;  %v512_v26 = vunpack.c.l.bf16 %v770_v13  ;;  %v513_v27 = vunpack.c.h.bf16 %v770_v13  ;;  %v777_v14 = vld [vmem:[%s1176_s0 + $0x80] sm:$0xff]  }
  0x15   :  { %797 = vst [vmem:[%s1179_s3 + $0x28] sm:$0xff] %v630_v19   ;;  %v163_v28 = vmul.f32 %v852_v1, %v509_v21  ;;  %v230_v29 = vadd.f32 %v857_v4, %v162_v22  ;;  %v516_v30 = vunpack.c.l.bf16 %v771_v18  ;;  %v517_v31 = vunpack.c.h.bf16 %v771_v18 }
  0x16   :  { %798 = vst [vmem:[%s1179_s3 + $0x30] sm:$0xff] %v635_v24   ;;  %v640_v32 = vpack.c.bf16 %v293_v25, %v292_v20  ;;  %v164_v33 = vmul.f32 %v852_v1, %v512_v26  ;;  %v165_v34 = vmul.f32 %v852_v1, %v513_v27  ;;  %v520_v35 = vunpack.c.l.bf16 %v772_v23  ;;  %v778_v27 = vld [vmem:[%s1176_s0 + $0x88] sm:$0xff]  }
  0x17   :  { %v231_v37 = vadd.f32 %v857_v4, %v163_v28  ;;  %v294_v38 = vmax.f32 %v230_v29, 0.0  ;;  %v166_v39 = vmul.f32 %v852_v1, %v516_v30  ;;  %v167_v40 = vmul.f32 %v852_v1, %v517_v31 }
  0x18   :  { %799 = vst [vmem:[%s1179_s3 + $0x38] sm:$0xff] %v640_v32   ;;  %v232_v41 = vadd.f32 %v857_v4, %v164_v33  ;;  %v233_v42 = vadd.f32 %v857_v4, %v165_v34  ;;  %v521_v43 = vunpack.c.h.bf16 %v772_v23  ;;  %v168_v44 = vmul.f32 %v852_v1, %v520_v35 }
  0x19   :  { %v295_v45 = vmax.f32 %v231_v37, 0.0  ;;  %v234_v46 = vadd.f32 %v857_v4, %v166_v39  ;;  %v235_v47 = vadd.f32 %v857_v4, %v167_v40  ;;  %v524_v48 = vunpack.c.l.bf16 %v773_v36 }
  0x1a   :  { %v296_v49 = vmax.f32 %v232_v41, 0.0  ;;  %v297_v50 = vmax.f32 %v233_v42, 0.0  ;;  %v169_v51 = vmul.f32 %v852_v1, %v521_v43  ;;  %v236_v52 = vadd.f32 %v857_v4, %v168_v44  ;;  %v780_v41 = vld [vmem:[%s1176_s0 + $0x98] sm:$0xff]  }
  0x1b   :  { %v645_v54 = vpack.c.bf16 %v295_v45, %v294_v38  ;;  %v298_v55 = vmax.f32 %v234_v46, 0.0  ;;  %v299_v56 = vmax.f32 %v235_v47, 0.0  ;;  %v525_v57 = vunpack.c.h.bf16 %v773_v36  ;;  %v779_v36 = vld [vmem:[%s1176_s0 + $0x90] sm:$0xff]  }
  0x1c   :  { %v650_v59 = vpack.c.bf16 %v297_v50, %v296_v49  ;;  %v237_v60 = vadd.f32 %v857_v4, %v169_v51  ;;  %v300_v61 = vmax.f32 %v236_v52, 0.0  ;;  %v170_v62 = vmul.f32 %v852_v1, %v524_v48 }
  0x1d   :  { %800 = vst [vmem:[%s1179_s3 + $0x40] sm:$0xff] %v645_v54   ;;  %v655_v0 = vpack.c.bf16 %v299_v56, %v298_v55  ;;  %v171_v2 = vmul.f32 %v852_v1, %v525_v57  ;;  %v528_v3 = vunpack.c.l.bf16 %v774_v53  ;;  %v529_v5 = vunpack.c.h.bf16 %v774_v53  ;;  %v781_v54 = vld [vmem:[%s1176_s0 + $0xa0] sm:$0xff]  }
  0x1e   :  { %801 = vst [vmem:[%s1179_s3 + $0x48] sm:$0xff] %v650_v59   ;;  %v301_v6 = vmax.f32 %v237_v60, 0.0  ;;  %v238_v7 = vadd.f32 %v857_v4, %v170_v62  ;;  %v532_v8 = vunpack.c.l.bf16 %v775_v58  ;;  %v533_v9 = vunpack.c.h.bf16 %v775_v58 }
  0x1f   :  { %802 = vst [vmem:[%s1179_s3 + $0x50] sm:$0xff] %v655_v0   ;;  %v239_v10 = vadd.f32 %v857_v4, %v171_v2  ;;  %v172_v11 = vmul.f32 %v852_v1, %v528_v3  ;;  %v173_v12 = vmul.f32 %v852_v1, %v529_v5  ;;  %v536_v13 = vunpack.c.l.bf16 %v776_v63  ;;  %v782_v5 = vld [vmem:[%s1176_s0 + $0xa8] sm:$0xff]  }
  0x20   :  { %v660_v15 = vpack.c.bf16 %v301_v6, %v300_v61  ;;  %v302_v16 = vmax.f32 %v238_v7, 0.0  ;;  %v174_v17 = vmul.f32 %v852_v1, %v532_v8  ;;  %v175_v18 = vmul.f32 %v852_v1, %v533_v9 }
  0x21   :  { %v303_v19 = vmax.f32 %v239_v10, 0.0  ;;  %v240_v20 = vadd.f32 %v857_v4, %v172_v11  ;;  %v241_v21 = vadd.f32 %v857_v4, %v173_v12  ;;  %v537_v22 = vunpack.c.h.bf16 %v776_v63 }
  0x22   :  { %803 = vst [vmem:[%s1179_s3 + $0x58] sm:$0xff] %v660_v15   ;;  %v242_v23 = vadd.f32 %v857_v4, %v174_v17  ;;  %v243_v24 = vadd.f32 %v857_v4, %v175_v18  ;;  %v176_v25 = vmul.f32 %v852_v1, %v536_v13  ;;  %v540_v26 = vunpack.c.l.bf16 %v777_v14 }
  0x23   :  { %v665_v28 = vpack.c.bf16 %v303_v19, %v302_v16  ;;  %v304_v29 = vmax.f32 %v240_v20, 0.0  ;;  %v305_v30 = vmax.f32 %v241_v21, 0.0  ;;  %v177_v31 = vmul.f32 %v852_v1, %v537_v22 }
  0x24   :  { %v306_v32 = vmax.f32 %v242_v23, 0.0  ;;  %v307_v33 = vmax.f32 %v243_v24, 0.0  ;;  %v244_v34 = vadd.f32 %v857_v4, %v176_v25  ;;  %v541_v35 = vunpack.c.h.bf16 %v777_v14  ;;  %v783_v14 = vld [vmem:[%s1176_s0 + $0xb0] sm:$0xff]   ;;  %v784_v23 = vld [vmem:[%s1176_s0 + $0xb8] sm:$0xff]  }
  0x25   :  { %804 = vst [vmem:[%s1179_s3 + $0x60] sm:$0xff] %v665_v28   ;;  %v670_v37 = vpack.c.bf16 %v305_v30, %v304_v29  ;;  %v245_v38 = vadd.f32 %v857_v4, %v177_v31  ;;  %v178_v39 = vmul.f32 %v852_v1, %v540_v26  ;;  %v544_v40 = vunpack.c.l.bf16 %v778_v27 }
  0x26   :  { %v675_v42 = vpack.c.bf16 %v307_v33, %v306_v32  ;;  %v308_v43 = vmax.f32 %v244_v34, 0.0  ;;  %v179_v44 = vmul.f32 %v852_v1, %v541_v35  ;;  %v545_v45 = vunpack.c.h.bf16 %v778_v27  ;;  %v785_v32 = vld [vmem:[%s1176_s0 + $0xc0] sm:$0xff]  }
  0x27   :  { %805 = vst [vmem:[%s1179_s3 + $0x68] sm:$0xff] %v670_v37   ;;  %v309_v46 = vmax.f32 %v245_v38, 0.0  ;;  %v246_v47 = vadd.f32 %v857_v4, %v178_v39  ;;  %v180_v48 = vmul.f32 %v852_v1, %v544_v40  ;;  %v548_v49 = vunpack.c.l.bf16 %v779_v36 }
  0x28   :  { %806 = vst [vmem:[%s1179_s3 + $0x70] sm:$0xff] %v675_v42   ;;  %v247_v50 = vadd.f32 %v857_v4, %v179_v44  ;;  %v181_v51 = vmul.f32 %v852_v1, %v545_v45  ;;  %v549_v52 = vunpack.c.h.bf16 %v779_v36  ;;  %v552_v53 = vunpack.c.l.bf16 %v780_v41  ;;  %v786_v45 = vld [vmem:[%s1176_s0 + $0xc8] sm:$0xff]  }
  0x29   :  { %v680_v55 = vpack.c.bf16 %v309_v46, %v308_v43  ;;  %v310_v56 = vmax.f32 %v246_v47, 0.0  ;;  %v248_v57 = vadd.f32 %v857_v4, %v180_v48  ;;  %v182_v58 = vmul.f32 %v852_v1, %v548_v49 }
  0x2a   :  { %v311_v59 = vmax.f32 %v247_v50, 0.0  ;;  %v249_v60 = vadd.f32 %v857_v4, %v181_v51  ;;  %v183_v61 = vmul.f32 %v852_v1, %v549_v52  ;;  %v553_v62 = vunpack.c.h.bf16 %v780_v41 }
  0x2b   :  { %807 = vst [vmem:[%s1179_s3 + $0x78] sm:$0xff] %v680_v55   ;;  %v312_v63 = vmax.f32 %v248_v57, 0.0  ;;  %v250_v0 = vadd.f32 %v857_v4, %v182_v58  ;;  %v184_v2 = vmul.f32 %v852_v1, %v552_v53  ;;  %v556_v3 = vunpack.c.l.bf16 %v781_v54 }
  0x2c   :  { %v685_v6 = vpack.c.bf16 %v311_v59, %v310_v56  ;;  %v313_v7 = vmax.f32 %v249_v60, 0.0  ;;  %v251_v8 = vadd.f32 %v857_v4, %v183_v61  ;;  %v185_v9 = vmul.f32 %v852_v1, %v553_v62 }
  0x2d   :  { %v314_v10 = vmax.f32 %v250_v0, 0.0  ;;  %v252_v11 = vadd.f32 %v857_v4, %v184_v2  ;;  %v557_v12 = vunpack.c.h.bf16 %v781_v54  ;;  %v186_v13 = vmul.f32 %v852_v1, %v556_v3  ;;  %v787_v54 = vld [vmem:[%s1176_s0 + $0xd0] sm:$0xff]  }
  0x2e   :  { %808 = vst [vmem:[%s1179_s3 + $0x80] sm:$0xff] %v685_v6   ;;  %v690_v15 = vpack.c.bf16 %v313_v7, %v312_v63  ;;  %v315_v16 = vmax.f32 %v251_v8, 0.0  ;;  %v253_v17 = vadd.f32 %v857_v4, %v185_v9  ;;  %v560_v18 = vunpack.c.l.bf16 %v782_v5  ;;  %v788_v63 = vld [vmem:[%s1176_s0 + $0xd8] sm:$0xff]  }
  0x2f   :  { %v316_v19 = vmax.f32 %v252_v11, 0.0  ;;  %v187_v20 = vmul.f32 %v852_v1, %v557_v12  ;;  %v254_v21 = vadd.f32 %v857_v4, %v186_v13  ;;  %v561_v22 = vunpack.c.h.bf16 %v782_v5 }
  0x30   :  { %809 = vst [vmem:[%s1179_s3 + $0x88] sm:$0xff] %v690_v15   ;;  %v695_v24 = vpack.c.bf16 %v315_v16, %v314_v10  ;;  %v317_v25 = vmax.f32 %v253_v17, 0.0  ;;  %v188_v26 = vmul.f32 %v852_v1, %v560_v18  ;;  %v564_v27 = vunpack.c.l.bf16 %v783_v14  ;;  %v789_v10 = vld [vmem:[%s1176_s0 + $0xe0] sm:$0xff]  }
  0x31   :  { %v255_v28 = vadd.f32 %v857_v4, %v187_v20  ;;  %v318_v29 = vmax.f32 %v254_v21, 0.0  ;;  %v189_v30 = vmul.f32 %v852_v1, %v561_v22  ;;  %v565_v31 = vunpack.c.h.bf16 %v783_v14 }
  0x32   :  { %810 = vst [vmem:[%s1179_s3 + $0x90] sm:$0xff] %v695_v24   ;;  %v700_v33 = vpack.c.bf16 %v317_v25, %v316_v19  ;;  %v256_v34 = vadd.f32 %v857_v4, %v188_v26  ;;  %v190_v35 = vmul.f32 %v852_v1, %v564_v27  ;;  %v568_v36 = vunpack.c.l.bf16 %v784_v23 }
  0x33   :  { %v319_v37 = vmax.f32 %v255_v28, 0.0  ;;  %v257_v38 = vadd.f32 %v857_v4, %v189_v30  ;;  %v191_v39 = vmul.f32 %v852_v1, %v565_v31  ;;  %v569_v40 = vunpack.c.h.bf16 %v784_v23  ;;  %v790_v23 = vld [vmem:[%s1176_s0 + $0xe8] sm:$0xff]  }
  0x34   :  { %811 = vst [vmem:[%s1179_s3 + $0x98] sm:$0xff] %v700_v33   ;;  %v320_v41 = vmax.f32 %v256_v34, 0.0  ;;  %v258_v42 = vadd.f32 %v857_v4, %v190_v35  ;;  %v192_v43 = vmul.f32 %v852_v1, %v568_v36  ;;  %v572_v44 = vunpack.c.l.bf16 %v785_v32 }
  0x35   :  { %v705_v46 = vpack.c.bf16 %v319_v37, %v318_v29  ;;  %v321_v47 = vmax.f32 %v257_v38, 0.0  ;;  %v259_v48 = vadd.f32 %v857_v4, %v191_v39  ;;  %v193_v49 = vmul.f32 %v852_v1, %v569_v40 }
  0x36   :  { %v322_v50 = vmax.f32 %v258_v42, 0.0  ;;  %v260_v51 = vadd.f32 %v857_v4, %v192_v43  ;;  %v573_v52 = vunpack.c.h.bf16 %v785_v32  ;;  %v194_v53 = vmul.f32 %v852_v1, %v572_v44  ;;  %v791_v32 = vld [vmem:[%s1176_s0 + $0xf0] sm:$0xff]  }
  0x37   :  { %812 = vst [vmem:[%s1179_s3 + $0xa0] sm:$0xff] %v705_v46   ;;  %v710_v55 = vpack.c.bf16 %v321_v47, %v320_v41  ;;  %v323_v56 = vmax.f32 %v259_v48, 0.0  ;;  %v261_v57 = vadd.f32 %v857_v4, %v193_v49  ;;  %v576_v58 = vunpack.c.l.bf16 %v786_v45  ;;  %v792_v41 = vld [vmem:[%s1176_s0 + $0xf8] sm:$0xff]  }
  0x38   :  { %v324_v59 = vmax.f32 %v260_v51, 0.0  ;;  %v195_v60 = vmul.f32 %v852_v1, %v573_v52  ;;  %v262_v61 = vadd.f32 %v857_v4, %v194_v53  ;;  %v577_v62 = vunpack.c.h.bf16 %v786_v45 }
  0x39   :  { %813 = vst [vmem:[%s1179_s3 + $0xa8] sm:$0xff] %v710_v55   ;;  %v715_v0 = vpack.c.bf16 %v323_v56, %v322_v50  ;;  %v325_v2 = vmax.f32 %v261_v57, 0.0  ;;  %v196_v3 = vmul.f32 %v852_v1, %v576_v58  ;;  %v580_v5 = vunpack.c.l.bf16 %v787_v54 }
  0x3a   :  { %v263_v6 = vadd.f32 %v857_v4, %v195_v60  ;;  %v326_v7 = vmax.f32 %v262_v61, 0.0  ;;  %v197_v8 = vmul.f32 %v852_v1, %v577_v62  ;;  %v581_v9 = vunpack.c.h.bf16 %v787_v54 }
  0x3b   :  { %814 = vst [vmem:[%s1179_s3 + $0xb0] sm:$0xff] %v715_v0   ;;  %v720_v11 = vpack.c.bf16 %v325_v2, %v324_v59  ;;  %v264_v12 = vadd.f32 %v857_v4, %v196_v3  ;;  %v198_v13 = vmul.f32 %v852_v1, %v580_v5  ;;  %v584_v14 = vunpack.c.l.bf16 %v788_v63 }
  0x3c   :  { %v327_v15 = vmax.f32 %v263_v6, 0.0  ;;  %v265_v16 = vadd.f32 %v857_v4, %v197_v8  ;;  %v199_v17 = vmul.f32 %v852_v1, %v581_v9  ;;  %v585_v18 = vunpack.c.h.bf16 %v788_v63 }
  0x3d   :  { %815 = vst [vmem:[%s1179_s3 + $0xb8] sm:$0xff] %v720_v11   ;;  %v328_v19 = vmax.f32 %v264_v12, 0.0  ;;  %v266_v20 = vadd.f32 %v857_v4, %v198_v13  ;;  %v200_v21 = vmul.f32 %v852_v1, %v584_v14  ;;  %v588_v22 = vunpack.c.l.bf16 %v789_v10 }
  0x3e   :  { %v725_v24 = vpack.c.bf16 %v327_v15, %v326_v7  ;;  %v329_v25 = vmax.f32 %v265_v16, 0.0  ;;  %v267_v26 = vadd.f32 %v857_v4, %v199_v17  ;;  %v201_v27 = vmul.f32 %v852_v1, %v585_v18 }
  0x3f   :  { %v330_v28 = vmax.f32 %v266_v20, 0.0  ;;  %v268_v29 = vadd.f32 %v857_v4, %v200_v21  ;;  %v589_v30 = vunpack.c.h.bf16 %v789_v10  ;;  %v202_v31 = vmul.f32 %v852_v1, %v588_v22 }
  0x40   :  { %816 = vst [vmem:[%s1179_s3 + $0xc0] sm:$0xff] %v725_v24   ;;  %v730_v33 = vpack.c.bf16 %v329_v25, %v328_v19  ;;  %v331_v34 = vmax.f32 %v267_v26, 0.0  ;;  %v269_v35 = vadd.f32 %v857_v4, %v201_v27  ;;  %v592_v36 = vunpack.c.l.bf16 %v790_v23 }
  0x41   :  { %v332_v37 = vmax.f32 %v268_v29, 0.0  ;;  %v203_v38 = vmul.f32 %v852_v1, %v589_v30  ;;  %v270_v39 = vadd.f32 %v857_v4, %v202_v31  ;;  %v593_v40 = vunpack.c.h.bf16 %v790_v23 }
  0x42   :  { %817 = vst [vmem:[%s1179_s3 + $0xc8] sm:$0xff] %v730_v33   ;;  %v735_v42 = vpack.c.bf16 %v331_v34, %v330_v28  ;;  %v333_v43 = vmax.f32 %v269_v35, 0.0  ;;  %v204_v44 = vmul.f32 %v852_v1, %v592_v36  ;;  %v596_v45 = vunpack.c.l.bf16 %v791_v32 }
  0x43   :  { %v271_v46 = vadd.f32 %v857_v4, %v203_v38  ;;  %v334_v47 = vmax.f32 %v270_v39, 0.0  ;;  %v205_v48 = vmul.f32 %v852_v1, %v593_v40  ;;  %v597_v49 = vunpack.c.h.bf16 %v791_v32 }
  0x44   :  { %818 = vst [vmem:[%s1179_s3 + $0xd0] sm:$0xff] %v735_v42   ;;  %v740_v50 = vpack.c.bf16 %v333_v43, %v332_v37  ;;  %v272_v51 = vadd.f32 %v857_v4, %v204_v44  ;;  %v206_v52 = vmul.f32 %v852_v1, %v596_v45  ;;  %v600_v53 = vunpack.c.l.bf16 %v792_v41 }
  0x45   :  { %v335_v54 = vmax.f32 %v271_v46, 0.0  ;;  %v273_v55 = vadd.f32 %v857_v4, %v205_v48  ;;  %v207_v56 = vmul.f32 %v852_v1, %v597_v49  ;;  %v601_v57 = vunpack.c.h.bf16 %v792_v41 }
  0x46   :  { %819 = vst [vmem:[%s1179_s3 + $0xd8] sm:$0xff] %v740_v50   ;;  %v336_v58 = vmax.f32 %v272_v51, 0.0  ;;  %v274_v59 = vadd.f32 %v857_v4, %v206_v52  ;;  %v208_v60 = vmul.f32 %v852_v1, %v600_v53 }
  0x47   :  { %v745_v61 = vpack.c.bf16 %v335_v54, %v334_v47  ;;  %v337_v62 = vmax.f32 %v273_v55, 0.0  ;;  %v275_v63 = vadd.f32 %v857_v4, %v207_v56  ;;  %v209_v0 = vmul.f32 %v852_v1, %v601_v57 }
  0x48   :  { %v338_v2 = vmax.f32 %v274_v59, 0.0  ;;  %v276_v3 = vadd.f32 %v857_v4, %v208_v60 }
  0x49   :  { %820 = vst [vmem:[%s1179_s3 + $0xe0] sm:$0xff] %v745_v61   ;;  %v750_v5 = vpack.c.bf16 %v337_v62, %v336_v58  ;;  %v339_v6 = vmax.f32 %v275_v63, 0.0  ;;  %v277_v7 = vadd.f32 %v857_v4, %v209_v0 }
  0x4a   :  { %v340_v8 = vmax.f32 %v276_v3, 0.0 }
  0x4b   :  { %821 = vst [vmem:[%s1179_s3 + $0xe8] sm:$0xff] %v750_v5   ;;  %v755_v9 = vpack.c.bf16 %v339_v6, %v338_v2  ;;  %v341_v10 = vmax.f32 %v277_v7, 0.0 }
  0x4d   :  { %822 = vst [vmem:[%s1179_s3 + $0xf0] sm:$0xff] %v755_v9   ;;  %v760_v1 = vpack.c.bf16 %v341_v10, %v340_v8 }
  0x4f   :  { %823 = vst [vmem:[%s1179_s3 + $0xf8] sm:$0xff] %v760_v1  }

// kernel: basic_block_forward.4
= control target key start
LH: loop header
LB: loop body
LE: loop exit
PB: predicated region body
PF: predicated region fallthrough
CT: control target
= control target key end

     0   :  { %s2380_s12 = smov 0   ;;  %s2382_s13 = smov 0   ;;  %s2916_s0 = inlined_call_operand.vmem [shape: bf16[512,1152], index: 0, kind: input, shape index: {}]   ;;  %s2917_s1 = inlined_call_operand.vmem [shape: bf16[1152,128], index: 1, kind: input, shape index: {}]   ;;  %s2918_s2 = inlined_call_operand.vmem [shape: bf16[512,128], index: 2, kind: output, shape index: {0}]   ;;  %s2919_s3 = inlined_call_operand.vmem [shape: f32[2,2,128], index: 3, kind: output, shape index: {1}]  }
   0x1   :  { %s2384_s14 = smov 0   ;;  %s2386_s15 = smov 0  }
   0x2   :  { %s2388_s16 = smov 0   ;;  %s2390_s17 = smov 0  }
   0x3   :  { %s2392_s18 = smov 0  }
   0x4 LB: > { %s26_s19 = sadd.s32 1, %s2349_s16  ;;  %s33_s20 = sadd.s32 1, %s2353_s17  ;;  %s2357_s18 = sphi %s2392_s18, %s14_s18   ;;  %s2353_s17 = sphi %s2390_s17, %s2925_s17   ;;  %s2349_s16 = sphi %s2388_s16, %s2924_s16   ;;  %s2345_s15 = sphi %s2386_s15, %s2923_s15   ;;  %s2341_s14 = sphi %s2384_s14, %s2922_s14   ;;  %s2337_s13 = sphi %s2382_s13, %s2921_s13   ;;  %s2333_s12 = sphi %s2380_s12, %s2920_s12  }
   0x5   : > { %p27_p0 = scmp.ge.s32.totalorder %s26_s19, 3  ;;  %p49_p1 = scmp.ne.s32.totalorder %s2337_s13, %s2333_s12 }
   0x6   : > { %p50_p2 = scmp.eq.s32.totalorder %s2357_s18, 0  ;;  %s42_s24 = sadd.s32 1, %s2337_s13 }
   0x7   : > { %s2927_s19 = smov (%p27_p0, %s26_s19), 0  ;;  %s2929_s20 = smov (!%p27_p0, %s33_s20), %s2353_s17 }
   0x8   : > { %p51_p3 = por %p50_p2, %p49_p1  ;;  %p35_p4 = scmp.ge.s32.totalorder %s2929_s20, 2 }
   0x9   : > { %s38_s21 = ssub.s32 %s2349_s16, %s2927_s19  ;;  %p1687_p6 = scmp.ge.s32.totalorder %s2357_s18, 6 }
   0xa   : > { %s2931_s20 = smov (%p35_p4, %s2929_s20), 0 }
   0xb   : > { %s37_s22 = ssub.s32 %s2353_s17, %s2931_s20  ;;  %159 = sbr.rel (%p1687_p6) target bundleno = 89 (0x59), region = 16 }
   0xc   : > { %s39_s23 = sor.u32 %s38_s21, %s37_s22 }
   0xd   : > { %p40_p5 = scmp.eq.s32.totalorder %s39_s23, 0 }
   0xf   : > { %s2431_s25 = scalar_select %p40_p5, %s2337_s13, %s42_s24  }
  0x10   : > { %162 = sbr.rel (!%p51_p3) target bundleno = 89 (0x59), region = 20  ;;  %s164_s26 = sand.u32 (%p51_p3), 1, %s2337_s13  }
  0x11   : > { %s168_s27 = smul.u32 (%p51_p3), 3, %s2349_s16 }
  0x12   : > { %s2243_s28 = smul.u32 (%p51_p3), 384, %s164_s26 }
  0x13   : > { %s2244_s29 = smul.u32 (%p51_p3), 288, %s2353_s17 }
  0x14   : > { %s2445_s8 = scalar_lea.vmem (%p51_p3), [#allocation3], %s2243_s28 }
  0x15   : > { %s170_s30 = sadd.s32 %s2244_s29, %s168_s27 }
  0x16   : > { %s1690_s4 = sshll.u32 %s170_s30, 2 }
  0x17   : > { %s2440_s7 = scalar_lea.vmem %s2916_s0, %s1690_s4 }
  0x18   : > { %v187_v0 = vld [vmem:[%s2440_s7] sm:$0xff]  ;;  %v191_v2 = vld [vmem:[%s2440_s7 + $0x48] sm:$0xff]  ;;  %v195_v4 = vld [vmem:[%s2440_s7 + $0x90] sm:$0xff] }
  0x19   : > { %v189_v1 = vld [vmem:[%s2440_s7 + $0x24] sm:$0xff]  ;;  %188 = vst [vmem:[%s2445_s8] sm:$0xff] %v187_v0  ;;  %v193_v3 = vld [vmem:[%s2440_s7 + $0x6c] sm:$0xff]  ;;  %v197_v5 = vld [vmem:[%s2440_s7 + $0xb4] sm:$0xff] }
  0x1a   : > { %190 = vst [vmem:[%s2445_s8 + $0xc] sm:$0xff] %v189_v1  ;;  %v199_v6 = vld [vmem:[%s2440_s7 + $0xd8] sm:$0xff]  ;;  %v203_v8 = vld [vmem:[%s2440_s7 + $0x120] sm:$0xff]  ;;  %v207_v10 = vld [vmem:[%s2440_s7 + $0x168] sm:$0xff] }
  0x1b   : > { %192 = vst [vmem:[%s2445_s8 + $0x18] sm:$0xff] %v191_v2  ;;  %v201_v7 = vld [vmem:[%s2440_s7 + $0xfc] sm:$0xff]  ;;  %v205_v9 = vld [vmem:[%s2440_s7 + $0x144] sm:$0xff]  ;;  %v209_v11 = vld [vmem:[%s2440_s7 + $0x18c] sm:$0xff] }
  0x1c   : > { %194 = vst [vmem:[%s2445_s8 + $0x24] sm:$0xff] %v193_v3  ;;  %v211_v12 = vld [vmem:[%s2440_s7 + $0x1b0] sm:$0xff]  ;;  %v215_v14 = vld [vmem:[%s2440_s7 + $0x1f8] sm:$0xff]  ;;  %v219_v16 = vld [vmem:[%s2440_s7 + $0x240] sm:$0xff] }
  0x1d   : > { %196 = vst [vmem:[%s2445_s8 + $0x30] sm:$0xff] %v195_v4  ;;  %v213_v13 = vld [vmem:[%s2440_s7 + $0x1d4] sm:$0xff]  ;;  %v217_v15 = vld [vmem:[%s2440_s7 + $0x21c] sm:$0xff]  ;;  %v221_v17 = vld [vmem:[%s2440_s7 + $0x264] sm:$0xff] }
  0x1e   : > { %198 = vst [vmem:[%s2445_s8 + $0x3c] sm:$0xff] %v197_v5  ;;  %v223_v18 = vld [vmem:[%s2440_s7 + $0x288] sm:$0xff]  ;;  %v227_v20 = vld [vmem:[%s2440_s7 + $0x2d0] sm:$0xff]  ;;  %v231_v22 = vld [vmem:[%s2440_s7 + $0x318] sm:$0xff] }
  0x1f   : > { %200 = vst [vmem:[%s2445_s8 + $0x48] sm:$0xff] %v199_v6  ;;  %v225_v19 = vld [vmem:[%s2440_s7 + $0x2ac] sm:$0xff]  ;;  %v229_v21 = vld [vmem:[%s2440_s7 + $0x2f4] sm:$0xff]  ;;  %v233_v23 = vld [vmem:[%s2440_s7 + $0x33c] sm:$0xff] }
  0x20   : > { %202 = vst [vmem:[%s2445_s8 + $0x54] sm:$0xff] %v201_v7  ;;  %v235_v24 = vld [vmem:[%s2440_s7 + $0x360] sm:$0xff]  ;;  %v239_v26 = vld [vmem:[%s2440_s7 + $0x3a8] sm:$0xff]  ;;  %v243_v28 = vld [vmem:[%s2440_s7 + $0x3f0] sm:$0xff] }
  0x21   : > { %204 = vst [vmem:[%s2445_s8 + $0x60] sm:$0xff] %v203_v8  ;;  %v237_v25 = vld [vmem:[%s2440_s7 + $0x384] sm:$0xff]  ;;  %v241_v27 = vld [vmem:[%s2440_s7 + $0x3cc] sm:$0xff]  ;;  %v245_v29 = vld [vmem:[%s2440_s7 + $0x414] sm:$0xff] }
  0x22   : > { %206 = vst [vmem:[%s2445_s8 + $0x6c] sm:$0xff] %v205_v9  ;;  %v247_v30 = vld [vmem:[%s2440_s7 + $0x438] sm:$0xff]  ;;  %v1691_v32 = vld [vmem:[%s2440_s7 + $0x8] sm:$0xf]  ;;  %v1693_v33 = vld [vmem:[%s2440_s7 + $0x2c] sm:$0xf] }
  0x23   : > { %208 = vst [vmem:[%s2445_s8 + $0x78] sm:$0xff] %v207_v10  ;;  %v249_v31 = vld [vmem:[%s2440_s7 + $0x45c] sm:$0xff]  ;;  %v1695_v34 = vld [vmem:[%s2440_s7 + $0x50] sm:$0xf]  ;;  %v1697_v35 = vld [vmem:[%s2440_s7 + $0x74] sm:$0xf] }
  0x24   : > { %210 = vst [vmem:[%s2445_s8 + $0x84] sm:$0xff] %v209_v11  ;;  %v1699_v36 = vld [vmem:[%s2440_s7 + $0x98] sm:$0xf]  ;;  %v1701_v37 = vld [vmem:[%s2440_s7 + $0xbc] sm:$0xf] }
  0x25   : > { %212 = vst [vmem:[%s2445_s8 + $0x90] sm:$0xff] %v211_v12  ;;  %v1703_v38 = vld [vmem:[%s2440_s7 + $0xe0] sm:$0xf]  ;;  %v1705_v39 = vld [vmem:[%s2440_s7 + $0x104] sm:$0xf] }
  0x26   : > { %214 = vst [vmem:[%s2445_s8 + $0x9c] sm:$0xff] %v213_v13  ;;  %v1707_v40 = vld [vmem:[%s2440_s7 + $0x128] sm:$0xf]  ;;  %v1709_v41 = vld [vmem:[%s2440_s7 + $0x14c] sm:$0xf] }
  0x27   : > { %216 = vst [vmem:[%s2445_s8 + $0xa8] sm:$0xff] %v215_v14  ;;  %v1711_v42 = vld [vmem:[%s2440_s7 + $0x170] sm:$0xf]  ;;  %v1713_v43 = vld [vmem:[%s2440_s7 + $0x194] sm:$0xf] }
  0x28   : > { %218 = vst [vmem:[%s2445_s8 + $0xb4] sm:$0xff] %v217_v15  ;;  %v1715_v44 = vld [vmem:[%s2440_s7 + $0x1b8] sm:$0xf]  ;;  %v1717_v45 = vld [vmem:[%s2440_s7 + $0x1dc] sm:$0xf] }
  0x29   : > { %220 = vst [vmem:[%s2445_s8 + $0xc0] sm:$0xff] %v219_v16  ;;  %v1719_v46 = vld [vmem:[%s2440_s7 + $0x200] sm:$0xf]  ;;  %v1721_v47 = vld [vmem:[%s2440_s7 + $0x224] sm:$0xf] }
  0x2a   : > { %222 = vst [vmem:[%s2445_s8 + $0xcc] sm:$0xff] %v221_v17  ;;  %v1723_v48 = vld [vmem:[%s2440_s7 + $0x248] sm:$0xf]  ;;  %v1725_v49 = vld [vmem:[%s2440_s7 + $0x26c] sm:$0xf] }
  0x2b   : > { %224 = vst [vmem:[%s2445_s8 + $0xd8] sm:$0xff] %v223_v18  ;;  %v1727_v50 = vld [vmem:[%s2440_s7 + $0x290] sm:$0xf]  ;;  %v1729_v51 = vld [vmem:[%s2440_s7 + $0x2b4] sm:$0xf] }
  0x2c   : > { %226 = vst [vmem:[%s2445_s8 + $0xe4] sm:$0xff] %v225_v19  ;;  %v1731_v52 = vld [vmem:[%s2440_s7 + $0x2d8] sm:$0xf]  ;;  %v1733_v53 = vld [vmem:[%s2440_s7 + $0x2fc] sm:$0xf] }
  0x2d   : > { %228 = vst [vmem:[%s2445_s8 + $0xf0] sm:$0xff] %v227_v20  ;;  %v1735_v54 = vld [vmem:[%s2440_s7 + $0x320] sm:$0xf]  ;;  %v1737_v55 = vld [vmem:[%s2440_s7 + $0x344] sm:$0xf] }
  0x2e   : > { %230 = vst [vmem:[%s2445_s8 + $0xfc] sm:$0xff] %v229_v21  ;;  %v1739_v56 = vld [vmem:[%s2440_s7 + $0x368] sm:$0xf]  ;;  %v1741_v57 = vld [vmem:[%s2440_s7 + $0x38c] sm:$0xf] }
  0x2f   : > { %232 = vst [vmem:[%s2445_s8 + $0x108] sm:$0xff] %v231_v22  ;;  %v1743_v58 = vld [vmem:[%s2440_s7 + $0x3b0] sm:$0xf]  ;;  %v1745_v59 = vld [vmem:[%s2440_s7 + $0x3d4] sm:$0xf] }
  0x30   : > { %234 = vst [vmem:[%s2445_s8 + $0x114] sm:$0xff] %v233_v23  ;;  %v1747_v60 = vld [vmem:[%s2440_s7 + $0x3f8] sm:$0xf]  ;;  %v1749_v61 = vld [vmem:[%s2440_s7 + $0x41c] sm:$0xf] }
  0x31   : > { %236 = vst [vmem:[%s2445_s8 + $0x120] sm:$0xff] %v235_v24  ;;  %v1751_v62 = vld [vmem:[%s2440_s7 + $0x440] sm:$0xf]  ;;  %v1753_v63 = vld [vmem:[%s2440_s7 + $0x464] sm:$0xf] }
  0x32   : > { %238 = vst [vmem:[%s2445_s8 + $0x12c] sm:$0xff] %v237_v25 }
  0x33   : > { %240 = vst [vmem:[%s2445_s8 + $0x138] sm:$0xff] %v239_v26 }
  0x34   : > { %242 = vst [vmem:[%s2445_s8 + $0x144] sm:$0xff] %v241_v27 }
  0x35   : > { %244 = vst [vmem:[%s2445_s8 + $0x150] sm:$0xff] %v243_v28 }
  0x36   : > { %246 = vst [vmem:[%s2445_s8 + $0x15c] sm:$0xff] %v245_v29 }
  0x37   : > { %248 = vst [vmem:[%s2445_s8 + $0x168] sm:$0xff] %v247_v30 }
  0x38   : > { %250 = vst [vmem:[%s2445_s8 + $0x174] sm:$0xff] %v249_v31 }
  0x39   : > { %1692 = vst [vmem:[%s2445_s8 + $0x8] sm:$0xf] %v1691_v32 }
  0x3a   : > { %1694 = vst [vmem:[%s2445_s8 + $0x14] sm:$0xf] %v1693_v33 }
  0x3b   : > { %1696 = vst [vmem:[%s2445_s8 + $0x20] sm:$0xf] %v1695_v34 }
  0x3c   : > { %1698 = vst [vmem:[%s2445_s8 + $0x2c] sm:$0xf] %v1697_v35 }
  0x3d   : > { %1700 = vst [vmem:[%s2445_s8 + $0x38] sm:$0xf] %v1699_v36 }
  0x3e   : > { %1702 = vst [vmem:[%s2445_s8 + $0x44] sm:$0xf] %v1701_v37 }
  0x3f   : > { %1704 = vst [vmem:[%s2445_s8 + $0x50] sm:$0xf] %v1703_v38 }
  0x40   : > { %1706 = vst [vmem:[%s2445_s8 + $0x5c] sm:$0xf] %v1705_v39 }
  0x41   : > { %1708 = vst [vmem:[%s2445_s8 + $0x68] sm:$0xf] %v1707_v40 }
  0x42   : > { %1710 = vst [vmem:[%s2445_s8 + $0x74] sm:$0xf] %v1709_v41 }
  0x43   : > { %1712 = vst [vmem:[%s2445_s8 + $0x80] sm:$0xf] %v1711_v42 }
  0x44   : > { %1714 = vst [vmem:[%s2445_s8 + $0x8c] sm:$0xf] %v1713_v43 }
  0x45   : > { %1716 = vst [vmem:[%s2445_s8 + $0x98] sm:$0xf] %v1715_v44 }
  0x46   : > { %1718 = vst [vmem:[%s2445_s8 + $0xa4] sm:$0xf] %v1717_v45 }
  0x47   : > { %1720 = vst [vmem:[%s2445_s8 + $0xb0] sm:$0xf] %v1719_v46 }
  0x48   : > { %1722 = vst [vmem:[%s2445_s8 + $0xbc] sm:$0xf] %v1721_v47 }
  0x49   : > { %1724 = vst [vmem:[%s2445_s8 + $0xc8] sm:$0xf] %v1723_v48 }
  0x4a   : > { %1726 = vst [vmem:[%s2445_s8 + $0xd4] sm:$0xf] %v1725_v49 }
  0x4b   : > { %1728 = vst [vmem:[%s2445_s8 + $0xe0] sm:$0xf] %v1727_v50 }
  0x4c   : > { %1730 = vst [vmem:[%s2445_s8 + $0xec] sm:$0xf] %v1729_v51 }
  0x4d   : > { %1732 = vst [vmem:[%s2445_s8 + $0xf8] sm:$0xf] %v1731_v52 }
  0x4e   : > { %1734 = vst [vmem:[%s2445_s8 + $0x104] sm:$0xf] %v1733_v53 }
  0x4f   : > { %1736 = vst [vmem:[%s2445_s8 + $0x110] sm:$0xf] %v1735_v54 }
  0x50   : > { %1738 = vst [vmem:[%s2445_s8 + $0x11c] sm:$0xf] %v1737_v55 }
  0x51   : > { %1740 = vst [vmem:[%s2445_s8 + $0x128] sm:$0xf] %v1739_v56 }
  0x52   : > { %1742 = vst [vmem:[%s2445_s8 + $0x134] sm:$0xf] %v1741_v57 }
  0x53   : > { %1744 = vst [vmem:[%s2445_s8 + $0x140] sm:$0xf] %v1743_v58 }
  0x54   : > { %1746 = vst [vmem:[%s2445_s8 + $0x14c] sm:$0xf] %v1745_v59 }
  0x55   : > { %1748 = vst [vmem:[%s2445_s8 + $0x158] sm:$0xf] %v1747_v60 }
  0x56   : > { %1750 = vst [vmem:[%s2445_s8 + $0x164] sm:$0xf] %v1749_v61 }
  0x57   : > { %1752 = vst [vmem:[%s2445_s8 + $0x170] sm:$0xf] %v1751_v62 }
  0x58   : > { %1754 = vst [vmem:[%s2445_s8 + $0x17c] sm:$0xf] %v1753_v63 }
  0x59 PF: > { %p1755_p7 = scmp.ge.s32.totalorder %s2357_s18, 1  ;;  %p339_p8 = scmp.lt.s32.totalorder %s2357_s18, 7 }
  0x5b   : > { %p340_p9 = pnand %p1755_p7, %p339_p8 }
  0x5c   : > { %s346_s9 = sand.u32 (!%p340_p9), 1, %s2333_s12   ;;  %s389_s10 = smul.u32 (!%p340_p9), 48, %s2341_s14 }
  0x5d   : > { %343 = sbr.rel (%p340_p9) target bundleno = 573 (0x23d), region = 50  ;;  %s1757_s21 = sshll.u32 (!%p340_p9), %s2345_s15, 5 }
  0x5e   : > { %s2245_s11 = smul.u32 (!%p340_p9), 384, %s346_s9  ;;  %p390_p10 = scmp.lt.s32.totalorder (!%p340_p9), %s389_s10, 143 }
  0x5f   : > { %p399_p11 = scmp.lt.s32.totalorder (!%p340_p9), %s1757_s21, 63  ;;  %p407_p12 = scmp.lt.s32.totalorder (!%p340_p9), %s2345_s15, 1 }
  0x60   : > { %s2594_s7 = scalar_lea.vmem (!%p340_p9), [#allocation3], %s2245_s11  ;;  %p1760_p13 = scmp.ne.s32.totalorder (!%p340_p9), %s2341_s14, 0 }
  0x62   : > { %s2933_s10 = smov (!%p390_p10, %s389_s10), 143  ;;  %s2935_s21 = smov (!%p399_p11, %s1757_s21), 63 }
  0x63   : > { %s1756_s22 = sshll.u32 %s2933_s10, 2  ;;  %s1758_s27 = sshll.u32 %s2935_s21, 2 }
  0x64   : > { %s2581_s26 = scalar_lea.vmem %s2917_s1, %s1756_s22  ;;  %s2586_s30 = scalar_lea.vmem %s2918_s2, %s1758_s27 }
  0x65   : > { %s2937_s15 = smov (!%p407_p12, %s2345_s15), 1  ;;  %417 = sbr.rel (%p1760_p13) target bundleno = 139 (0x8b), region = 58 }
  0x66   : > { %s1759_s12 = sshll.u32 %s2937_s15, 1 }
  0x67   : > { %s2592_s6 = scalar_lea.vmem %s2919_s3, %s1759_s12 }
  0x6a   : > { %v2359_v0 = vmov 0.0  }
  0x6b   : > { %418 = vst [vmem:[#allocation2 + $0xb0] sm:$0xff] %v2359_v0 }
  0x6c   : > { %419 = vst [vmem:[#allocation2] sm:$0xff] %v2359_v0 }
  0x6d   : > { %420 = vst [vmem:[#allocation2 + $0xd8] sm:$0xff] %v2359_v0 }
  0x6e   : > { %421 = vst [vmem:[#allocation2 + $0x18] sm:$0xff] %v2359_v0 }
  0x6f   : > { %422 = vst [vmem:[#allocation2 + $0x50] sm:$0xff] %v2359_v0 }
  0x70   : > { %423 = vst [vmem:[#allocation2 + $0x68] sm:$0xff] %v2359_v0 }
  0x71   : > { %424 = vst [vmem:[#allocation2 + $0x30] sm:$0xff] %v2359_v0 }
  0x72   : > { %425 = vst [vmem:[#allocation2 + $0x48] sm:$0xff] %v2359_v0 }
  0x73   : > { %426 = vst [vmem:[#allocation2 + $0x80] sm:$0xff] %v2359_v0 }
  0x74   : > { %427 = vst [vmem:[#allocation2 + $0x88] sm:$0xff] %v2359_v0 }
  0x75   : > { %428 = vst [vmem:[#allocation2 + $0xe8] sm:$0xff] %v2359_v0 }
  0x76   : > { %429 = vst [vmem:[#allocation2 + $0xb8] sm:$0xff] %v2359_v0 }
  0x77   : > { %430 = vst [vmem:[#allocation2 + $0x60] sm:$0xff] %v2359_v0 }
  0x78   : > { %431 = vst [vmem:[#allocation2 + $0xf0] sm:$0xff] %v2359_v0 }
  0x79   : > { %432 = vst [vmem:[#allocation2 + $0x8] sm:$0xff] %v2359_v0 }
  0x7a   : > { %433 = vst [vmem:[#allocation2 + $0x78] sm:$0xff] %v2359_v0 }
  0x7b   : > { %434 = vst [vmem:[#allocation2 + $0x38] sm:$0xff] %v2359_v0 }
  0x7c   : > { %435 = vst [vmem:[#allocation2 + $0x58] sm:$0xff] %v2359_v0 }
  0x7d   : > { %436 = vst [vmem:[#allocation2 + $0x40] sm:$0xff] %v2359_v0 }
  0x7e   : > { %437 = vst [vmem:[#allocation2 + $0xc8] sm:$0xff] %v2359_v0 }
  0x7f   : > { %438 = vst [vmem:[#allocation2 + $0xe0] sm:$0xff] %v2359_v0 }
  0x80   : > { %439 = vst [vmem:[#allocation2 + $0x90] sm:$0xff] %v2359_v0 }
  0x81   : > { %440 = vst [vmem:[#allocation2 + $0x70] sm:$0xff] %v2359_v0 }
  0x82   : > { %441 = vst [vmem:[#allocation2 + $0xc0] sm:$0xff] %v2359_v0 }
  0x83   : > { %442 = vst [vmem:[#allocation2 + $0xa8] sm:$0xff] %v2359_v0 }
  0x84   : > { %443 = vst [vmem:[#allocation2 + $0xd0] sm:$0xff] %v2359_v0 }
  0x85   : > { %444 = vst [vmem:[#allocation2 + $0x10] sm:$0xff] %v2359_v0 }
  0x86   : > { %445 = vst [vmem:[#allocation2 + $0x28] sm:$0xff] %v2359_v0 }
  0x87   : > { %446 = vst [vmem:[#allocation2 + $0xa0] sm:$0xff] %v2359_v0 }
  0x88   : > { %447 = vst [vmem:[#allocation2 + $0xf8] sm:$0xff] %v2359_v0 }
  0x89   : > { %448 = vst [vmem:[#allocation2 + $0x20] sm:$0xff] %v2359_v0 }
  0x8a   : > { %449 = vst [vmem:[#allocation2 + $0x98] sm:$0xff] %v2359_v0 }
  0x8b PF: > { %v2107_v1 = vld [vmem:[%s2581_s26 + $0x38] sm:$0xff]  ;;  %v2106_v4 = vld [vmem:[%s2581_s26 + $0x30] sm:$0xff]  ;;  %v2105_v7 = vld [vmem:[%s2581_s26 + $0x28] sm:$0xff]  ;;  %p2049_p0 = scmp.ne.s32.totalorder %s2341_s14, 2 }
  0x8c   : > { %v2599_v2 = vld [vmem:[%s2581_s26 + $0x78] sm:$0xff]  ;;  %994 = vmatpush.bf16.msra.mxu0 %v2107_v1  ;;  %2219 = vmatpush.bf16.msra.mxu3 %v2107_v1  ;;  %v2608_v5 = vld [vmem:[%s2581_s26 + $0x70] sm:$0xff]  ;;  %v2113_v8 = vld [vmem:[%s2581_s26 + $0x68] sm:$0xff] }
  0x8d   : > { %v2602_v3 = vld [vmem:[%s2581_s26 + $0xb8] sm:$0xff]  ;;  %1083 = vmatpush.bf16.msra.mxu1 %v2599_v2  ;;  %v2611_v6 = vld [vmem:[%s2581_s26 + $0xb0] sm:$0xff]  ;;  %v2618_v9 = vld [vmem:[%s2581_s26 + $0xa8] sm:$0xff] }
  0x8e   : > { %1172 = vmatpush.bf16.msra.mxu2 %v2602_v3  ;;  %v2104_v10 = vld [vmem:[%s2581_s26 + $0x20] sm:$0xff]  ;;  %v2103_v13 = vld [vmem:[%s2581_s26 + $0x18] sm:$0xff]  ;;  %v2102_v16 = vld [vmem:[%s2581_s26 + $0x10] sm:$0xff] }
  0x8f   : > { %v2112_v11 = vld [vmem:[%s2581_s26 + $0x60] sm:$0xff]  ;;  %v2111_v14 = vld [vmem:[%s2581_s26 + $0x58] sm:$0xff]  ;;  %v2110_v17 = vld [vmem:[%s2581_s26 + $0x50] sm:$0xff] }
  0x90   : > { %995 = vmatpush.bf16.msra.mxu0 %v2106_v4  ;;  %2220 = vmatpush.bf16.msra.mxu3 %v2106_v4  ;;  %v2624_v12 = vld [vmem:[%s2581_s26 + $0xa0] sm:$0xff]  ;;  %v2630_v15 = vld [vmem:[%s2581_s26 + $0x98] sm:$0xff]  ;;  %v2636_v18 = vld [vmem:[%s2581_s26 + $0x90] sm:$0xff] }
  0x91   : > { %1084 = vmatpush.bf16.msra.mxu1 %v2608_v5  ;;  %v2101_v19 = vld [vmem:[%s2581_s26 + $0x8] sm:$0xff]  ;;  %v2100_v22 = vld [vmem:[%s2581_s26] sm:$0xff]  ;;  %v1765_v30 = vld [vmem:[%s2594_s7 + $0xc] sm:$0xf0] }
  0x92   : > { %1173 = vmatpush.bf16.msra.mxu2 %v2611_v6  ;;  %v2109_v20 = vld [vmem:[%s2581_s26 + $0x48] sm:$0xff]  ;;  %v2108_v23 = vld [vmem:[%s2581_s26 + $0x40] sm:$0xff]  ;;  %v2054_v32 = vld [vmem:[%s2594_s7 + $0x10] sm:$0xf0] }
  0x93   : > { %v2642_v21 = vld [vmem:[%s2581_s26 + $0x88] sm:$0xff]  ;;  %v2647_v24 = vld [vmem:[%s2581_s26 + $0x80] sm:$0xff]  ;;  %v1775_v37 = vld [vmem:[%s2594_s7 + $0x18] sm:$0xf] }
  0x94   : > { %996 = vmatpush.bf16.msra.mxu0 %v2105_v7  ;;  %2221 = vmatpush.bf16.msra.mxu3 %v2105_v7  ;;  %v1763_v25 = vld [vmem:[%s2594_s7] sm:$0xf]  ;;  %v2053_v26 = vld [vmem:[%s2594_s7 + $0x8] sm:$0xf0]  ;;  %v2052_v29 = vld [vmem:[%s2594_s7 + $0x4] sm:$0xf] }
  0x95   : > { %1085 = vmatpush.bf16.msra.mxu1 %v2113_v8  ;;  %v1907_v27 = vld [vmem:[%s2594_s7 + $0x120] sm:$0xf]  ;;  %v2089_v28 = vld [vmem:[%s2594_s7 + $0x128] sm:$0xf0]  ;;  %v1771_v31 = vld [vmem:[%s2594_s7 + $0x8] sm:$0xf]  ;;  %v1764_v33 = vor.u32 %v2053_v26, %v1763_v25  ;;  %v1768_v35 = vor.u32 %v2052_v29, %v1765_v30 }
  0x96   : > { %1174 = vmatpush.bf16.msra.mxu2 %v2618_v9  ;;  %v1908_v34 = vor.u32 %v2089_v28, %v1907_v27  ;;  %v1772_v36 = vor.u32 %v2054_v32, %v1771_v31  ;;  %v2056_v38 = vld [vmem:[%s2594_s7 + $0x20] sm:$0xf0]  ;;  %v1919_v39 = vld [vmem:[%s2594_s7 + $0x138] sm:$0xf]  ;;  %v2055_v41 = vld [vmem:[%s2594_s7 + $0x1c] sm:$0xf] }
  0x97   : > { %v2092_v40 = vld [vmem:[%s2594_s7 + $0x140] sm:$0xf0]  ;;  %v1777_v42 = vld [vmem:[%s2594_s7 + $0x24] sm:$0xf0]  ;;  %v1783_v43 = vld [vmem:[%s2594_s7 + $0x20] sm:$0xf]  ;;  %v1776_v45 = vor.u32 %v2056_v38, %v1775_v37 }
  0x98   : > { %997 = vmatpush.bf16.msra.mxu0 %v2104_v10  ;;  %2222 = vmatpush.bf16.msra.mxu3 %v2104_v10  ;;  %v2057_v44 = vld [vmem:[%s2594_s7 + $0x28] sm:$0xf0]  ;;  %v1920_v46 = vor.u32 %v2092_v40, %v1919_v39  ;;  %v1780_v47 = vor.u32 %v2055_v41, %v1777_v42  ;;  %v1787_v49 = vld [vmem:[%s2594_s7 + $0x30] sm:$0xf]  ;;  %v2059_v50 = vld [vmem:[%s2594_s7 + $0x38] sm:$0xf0] }
  0x99   : > { %1086 = vmatpush.bf16.msra.mxu1 %v2112_v11  ;;  %v1784_v48 = vor.u32 %v2057_v44, %v1783_v43  ;;  %v1931_v51 = vld [vmem:[%s2594_s7 + $0x150] sm:$0xf]  ;;  %v2095_v52 = vld [vmem:[%s2594_s7 + $0x158] sm:$0xf0]  ;;  %v2058_v53 = vld [vmem:[%s2594_s7 + $0x34] sm:$0xf]  ;;  %v1788_v57 = vor.u32 %v2059_v50, %v1787_v49 }
  0x9a   : > { %1175 = vmatpush.bf16.msra.mxu2 %v2624_v12  ;;  %v1789_v54 = vld [vmem:[%s2594_s7 + $0x3c] sm:$0xf0]  ;;  %v1795_v55 = vld [vmem:[%s2594_s7 + $0x38] sm:$0xf]  ;;  %v2060_v56 = vld [vmem:[%s2594_s7 + $0x40] sm:$0xf0]  ;;  %v1932_v58 = vor.u32 %v2095_v52, %v1931_v51 }
  0x9b   : > { %v1792_v59 = vor.u32 %v2058_v53, %v1789_v54  ;;  %v1796_v60 = vor.u32 %v2060_v56, %v1795_v55  ;;  %v1799_v61 = vld [vmem:[%s2594_s7 + $0x48] sm:$0xf]  ;;  %v2062_v62 = vld [vmem:[%s2594_s7 + $0x50] sm:$0xf0]  ;;  %v2061_v1 = vld [vmem:[%s2594_s7 + $0x4c] sm:$0xf] }
  0x9c   : > { %998 = vmatpush.bf16.msra.mxu0 %v2103_v13  ;;  %2223 = vmatpush.bf16.msra.mxu3 %v2103_v13  ;;  %v1943_v63 = vld [vmem:[%s2594_s7 + $0x168] sm:$0xf]  ;;  %v2098_v0 = vld [vmem:[%s2594_s7 + $0x170] sm:$0xf0]  ;;  %v2063_v4 = vld [vmem:[%s2594_s7 + $0x58] sm:$0xf0] }
  0x9d   : > { %1087 = vmatpush.bf16.msra.mxu1 %v2111_v14  ;;  %v2065_v10 = vld [vmem:[%s2594_s7 + $0x68] sm:$0xf0]  ;;  %v1909_v13 = vld [vmem:[%s2594_s7 + $0x12c] sm:$0xf0]  ;;  %v2091_v25 = vld [vmem:[%s2594_s7 + $0x13c] sm:$0xf] }
  0x9e   : > { %1176 = vmatpush.bf16.msra.mxu2 %v2630_v15  ;;  %v1921_v26 = vld [vmem:[%s2594_s7 + $0x144] sm:$0xf0]  ;;  %v1831_v27 = vld [vmem:[%s2594_s7 + $0x80] sm:$0xf]  ;;  %v2069_v28 = vld [vmem:[%s2594_s7 + $0x88] sm:$0xf0] }
  0x9f   : > { %v1924_v30 = vor.u32 %v2091_v25, %v1921_v26  ;;  %v1832_v32 = vor.u32 %v2069_v28, %v1831_v27  ;;  %v1933_v37 = vld [vmem:[%s2594_s7 + $0x15c] sm:$0xf0]  ;;  %v1843_v39 = vld [vmem:[%s2594_s7 + $0x98] sm:$0xf]  ;;  %v2072_v40 = vld [vmem:[%s2594_s7 + $0xa0] sm:$0xf0] }
  0xa0   : > { %999 = vmatpush.bf16.msra.mxu0 %v2102_v16  ;;  %2224 = vmatpush.bf16.msra.mxu3 %v2102_v16  ;;  %v2066_v16 = vld [vmem:[%s2594_s7 + $0x70] sm:$0xf0]  ;;  %v1837_v38 = vld [vmem:[%s2594_s7 + $0x9c] sm:$0xf0]  ;;  %v1844_v44 = vor.u32 %v2072_v40, %v1843_v39  ;;  %v1945_v49 = vld [vmem:[%s2594_s7 + $0x174] sm:$0xf0] }
  0xa1   : > { %1088 = vmatpush.bf16.msra.mxu1 %v2110_v17  ;;  %v1849_v50 = vld [vmem:[%s2594_s7 + $0xb4] sm:$0xf0]  ;;  %v1855_v51 = vld [vmem:[%s2594_s7 + $0xb0] sm:$0xf]  ;;  %v2075_v52 = vld [vmem:[%s2594_s7 + $0xb8] sm:$0xf0] }
  0xa2   : > { %1177 = vmatpush.bf16.msra.mxu2 %v2636_v18  ;;  %v1856_v56 = vor.u32 %v2075_v52, %v1855_v51  ;;  %v451_v26 = vld [vmem:[#allocation2] sm:$0xff] }
  0xa4   : > { %1000 = vmatpush.bf16.msra.mxu0 %v2101_v19  ;;  %2225 = vmatpush.bf16.msra.mxu3 %v2101_v19 }
  0xa5   : > { %1089 = vmatpush.bf16.msra.mxu1 %v2109_v20 }
  0xa6   : > { %1178 = vmatpush.bf16.msra.mxu2 %v2642_v21 }
  0xa8   : > { %1001 = vmatpush.bf16.msra.mxu0 %v2100_v22  ;;  %2226 = vmatpush.bf16.msra.mxu3 %v2100_v22  ;;  %v2068_v22 = vld [vmem:[%s2594_s7 + $0x80] sm:$0xf0] }
  0xa9   : > { %1090 = vmatpush.bf16.msra.mxu1 %v2108_v23 }
  0xaa   : > { %1179 = vmatpush.bf16.msra.mxu2 %v2647_v24 }
  0xab   : > { %1002 = vmatmul.bf16.vlgmr.msra.gmra.mxu0 %v1764_v33  ;;  %1062 = vmatmul.bf16.vlgmr.msra.gmra.mxu3 %v1908_v34  ;;  %v1835_v33 = vld [vmem:[%s2594_s7 + $0x90] sm:$0xf]  ;;  %v2071_v34 = vld [vmem:[%s2594_s7 + $0x98] sm:$0xf0] }
  0xac   : > { %2227 = vmatpush.bf16.msrb.mxu3 %v2599_v2  ;;  %1091 = vmatmul.bf16.vlgmr.msra.gmra.mxu1 %v1768_v35  ;;  %v1801_v2 = vld [vmem:[%s2594_s7 + $0x54] sm:$0xf0]  ;;  %v2070_v35 = vld [vmem:[%s2594_s7 + $0x94] sm:$0xf]  ;;  %v1836_v41 = vor.u32 %v2071_v34, %v1835_v33 }
  0xad   : > { %1180 = vmatmul.bf16.vlgmr.msra.gmra.mxu2 %v1772_v36  ;;  %v1804_v7 = vor.u32 %v2061_v1, %v1801_v2  ;;  %v2094_v36 = vld [vmem:[%s2594_s7 + $0x154] sm:$0xf]  ;;  %v1840_v43 = vor.u32 %v2070_v35, %v1837_v38 }
  0xae   : > { %v1936_v42 = vor.u32 %v2094_v36, %v1933_v37  ;;  %v452_v37 = vld [vmem:[#allocation2 + $0xd8] sm:$0xff] }
  0xb0   : > { %2228 = vmatpush.bf16.msrb.mxu3 %v2608_v5  ;;  %v1800_v5 = vor.u32 %v2062_v62, %v1799_v61  ;;  %v2090_v61 = vld [vmem:[%s2594_s7 + $0x130] sm:$0xf0]  ;;  %v1861_v62 = vld [vmem:[%s2594_s7 + $0xcc] sm:$0xf0] }
  0xb4   : > { %2229 = vmatpush.bf16.msrb.mxu3 %v2113_v8 }
  0xb8   : > { %2230 = vmatpush.bf16.msrb.mxu3 %v2112_v11  ;;  %v2064_v11 = vld [vmem:[%s2594_s7 + $0x64] sm:$0xf] }
  0xbb   : > { %1007 = vmatmul.bf16.gmra.mxu0 %v1776_v45  ;;  %1067 = vmatmul.bf16.gmra.mxu3 %v1920_v46  ;;  %v1847_v45 = vld [vmem:[%s2594_s7 + $0xa8] sm:$0xf]  ;;  %v2074_v46 = vld [vmem:[%s2594_s7 + $0xb0] sm:$0xf0] }
  0xbc   : > { %2231 = vmatpush.bf16.msrb.mxu3 %v2111_v14  ;;  %1096 = vmatmul.bf16.gmra.mxu1 %v1780_v47  ;;  %v1813_v14 = vld [vmem:[%s2594_s7 + $0x6c] sm:$0xf0]  ;;  %v2073_v47 = vld [vmem:[%s2594_s7 + $0xac] sm:$0xf]  ;;  %v1848_v53 = vor.u32 %v2074_v46, %v1847_v45  ;;  %v2082_v45 = vld [vmem:[%s2594_s7 + $0xf4] sm:$0xf] }
  0xbd   : > { %1185 = vmatmul.bf16.gmra.mxu2 %v1784_v48  ;;  %v1816_v19 = vor.u32 %v2064_v11, %v1813_v14  ;;  %v2097_v48 = vld [vmem:[%s2594_s7 + $0x16c] sm:$0xf]  ;;  %v1852_v55 = vor.u32 %v2073_v47, %v1849_v50  ;;  %v1939_v46 = vld [vmem:[%s2594_s7 + $0x158] sm:$0xf]  ;;  %v2096_v47 = vld [vmem:[%s2594_s7 + $0x160] sm:$0xf0] }
  0xbe   : > { %v1948_v54 = vor.u32 %v2097_v48, %v1945_v49  ;;  %v1885_v48 = vld [vmem:[%s2594_s7 + $0xfc] sm:$0xf0]  ;;  %v1891_v49 = vld [vmem:[%s2594_s7 + $0xf8] sm:$0xf]  ;;  %v2084_v50 = vld [vmem:[%s2594_s7 + $0x100] sm:$0xf0] }
  0xc0   : > { %2232 = vmatpush.bf16.msrb.mxu3 %v2110_v17 }
  0xc4   : > { %2233 = vmatpush.bf16.msrb.mxu3 %v2109_v20 }
  0xc8   : > { %2234 = vmatpush.bf16.msrb.mxu3 %v2108_v23  ;;  %v2067_v23 = vld [vmem:[%s2594_s7 + $0x7c] sm:$0xf] }
  0xcb   : > { %1012 = vmatmul.bf16.gmra.mxu0 %v1788_v57  ;;  %1072 = vmatmul.bf16.gmra.mxu3 %v1932_v58  ;;  %v1859_v57 = vld [vmem:[%s2594_s7 + $0xc0] sm:$0xf]  ;;  %v2077_v58 = vld [vmem:[%s2594_s7 + $0xc8] sm:$0xf0] }
  0xcc   : > { %2235 = vmatpush.bf16.msra.mxu3 %v2602_v3  ;;  %1101 = vmatmul.bf16.gmra.mxu1 %v1792_v59  ;;  %v1807_v3 = vld [vmem:[%s2594_s7 + $0x50] sm:$0xf]  ;;  %v2076_v59 = vld [vmem:[%s2594_s7 + $0xc4] sm:$0xf]  ;;  %v1860_v1 = vor.u32 %v2077_v58, %v1859_v57 }
  0xcd   : > { %1190 = vmatmul.bf16.gmra.mxu2 %v1796_v60  ;;  %v1808_v8 = vor.u32 %v2063_v4, %v1807_v3  ;;  %v1915_v60 = vld [vmem:[%s2594_s7 + $0x128] sm:$0xf]  ;;  %v1864_v4 = vor.u32 %v2076_v59, %v1861_v62  ;;  %v1888_v59 = vor.u32 %v2082_v45, %v1885_v48  ;;  %v458_v48 = vld [vmem:[#allocation2 + $0x80] sm:$0xff] }
  0xce   : > { %v1916_v2 = vor.u32 %v2090_v61, %v1915_v60  ;;  %v1892_v60 = vor.u32 %v2084_v50, %v1891_v49 }
  0xd0   : > { %2236 = vmatpush.bf16.msra.mxu3 %v2611_v6  ;;  %v1944_v6 = vor.u32 %v2098_v0, %v1943_v63  ;;  %v1867_v63 = vld [vmem:[%s2594_s7 + $0xc8] sm:$0xf]  ;;  %v2078_v0 = vld [vmem:[%s2594_s7 + $0xd0] sm:$0xf0] }
  0xd4   : > { %2237 = vmatpush.bf16.msra.mxu3 %v2618_v9  ;;  %v1811_v9 = vld [vmem:[%s2594_s7 + $0x60] sm:$0xf] }
  0xd5   : > { %v1812_v17 = vor.u32 %v2065_v10, %v1811_v9  ;;  %v450_v9 = vld [vmem:[#allocation2 + $0xb0] sm:$0xff] }
  0xd8   : > { %2238 = vmatpush.bf16.msra.mxu3 %v2624_v12  ;;  %v2088_v12 = vld [vmem:[%s2594_s7 + $0x124] sm:$0xf] }
  0xdb   : > { %1017 = vmatmul.bf16.gmra.mxu0 %v1800_v5  ;;  %1077 = vmatmul.bf16.gmra.mxu3 %v1944_v6  ;;  %v1868_v5 = vor.u32 %v2078_v0, %v1867_v63 }
  0xdc   : > { %2239 = vmatpush.bf16.msra.mxu3 %v2630_v15  ;;  %1106 = vmatmul.bf16.gmra.mxu1 %v1804_v7  ;;  %v1819_v15 = vld [vmem:[%s2594_s7 + $0x68] sm:$0xf] }
  0xdd   : > { %1195 = vmatmul.bf16.gmra.mxu2 %v1808_v8  ;;  %v1820_v20 = vor.u32 %v2066_v16, %v1819_v15  ;;  %v1871_v15 = vld [vmem:[%s2594_s7 + $0xd8] sm:$0xf]  ;;  %v2080_v16 = vld [vmem:[%s2594_s7 + $0xe0] sm:$0xf0] }
  0xde   : > { %v1872_v27 = vor.u32 %v2080_v16, %v1871_v15  ;;  %v2087_v15 = vld [vmem:[%s2594_s7 + $0x118] sm:$0xf0] }
  0xe0   : > { %2240 = vmatpush.bf16.msra.mxu3 %v2636_v18  ;;  %v1912_v18 = vor.u32 %v2088_v12, %v1909_v13 }
  0xe4   : > { %2241 = vmatpush.bf16.msra.mxu3 %v2642_v21  ;;  %v1823_v21 = vld [vmem:[%s2594_s7 + $0x78] sm:$0xf] }
  0xe5   : > { %v1824_v29 = vor.u32 %v2068_v22, %v1823_v21  ;;  %v1879_v21 = vld [vmem:[%s2594_s7 + $0xe0] sm:$0xf]  ;;  %v2081_v22 = vld [vmem:[%s2594_s7 + $0xe8] sm:$0xf0] }
  0xe8   : > { %2242 = vmatpush.bf16.msra.mxu3 %v2647_v24  ;;  %v1825_v24 = vld [vmem:[%s2594_s7 + $0x84] sm:$0xf0] }
  0xe9   : > { %v1828_v31 = vor.u32 %v2067_v23, %v1825_v24 }
  0xeb   : > { %1022 = vmatmul.bf16.gmra.mxu0 %v1812_v17  ;;  %1151 = vmatmul.bf16.vlgmr.msrb.gmra.mxu3 %v1912_v18  ;;  %v2079_v17 = vld [vmem:[%s2594_s7 + $0xdc] sm:$0xf]  ;;  %v1927_v18 = vld [vmem:[%s2594_s7 + $0x140] sm:$0xf] }
  0xec   : > { %1111 = vmatmul.bf16.gmra.mxu1 %v1816_v19  ;;  %v2093_v19 = vld [vmem:[%s2594_s7 + $0x148] sm:$0xf0] }
  0xed   : > { %1200 = vmatmul.bf16.gmra.mxu2 %v1820_v20  ;;  %v1873_v20 = vld [vmem:[%s2594_s7 + $0xe4] sm:$0xf0]  ;;  %v1928_v28 = vor.u32 %v2093_v19, %v1927_v18 }
  0xee   : > { %v455_v18 = vld [vmem:[#allocation2 + $0x68] sm:$0xff] }
  0xfb   : > { %1027 = vmatmul.bf16.gmra.mxu0 %v1824_v29  ;;  %1156 = vmatmul.bf16.gmra.mxu3 %v1924_v30 }
  0xfc   : > { %1116 = vmatmul.bf16.gmra.mxu1 %v1828_v31  ;;  %v1876_v31 = vor.u32 %v2079_v17, %v1873_v20 }
  0xfd   : > { %1205 = vmatmul.bf16.gmra.mxu2 %v1832_v32  ;;  %v1880_v32 = vor.u32 %v2081_v22, %v1879_v21 }
 0x10b   : > { %1032 = vmatmul.bf16.gmra.mxu0 %v1836_v41  ;;  %1161 = vmatmul.bf16.gmra.mxu3 %v1936_v42 }
 0x10c   : > { %1121 = vmatmul.bf16.gmra.mxu1 %v1840_v43  ;;  %v1883_v43 = vld [vmem:[%s2594_s7 + $0xf0] sm:$0xf] }
 0x10d   : > { %1210 = vmatmul.bf16.gmra.mxu2 %v1844_v44  ;;  %v2083_v44 = vld [vmem:[%s2594_s7 + $0xf8] sm:$0xf0] }
 0x11b   : > { %1037 = vmatmul.bf16.gmra.mxu0 %v1848_v53  ;;  %1166 = vmatmul.bf16.gmra.mxu3 %v1948_v54  ;;  %v453_v53 = vld [vmem:[#allocation2 + $0x18] sm:$0xff] }
 0x11c   : > { %1126 = vmatmul.bf16.gmra.mxu1 %v1852_v55  ;;  %v1884_v55 = vor.u32 %v2083_v44, %v1883_v43 }
 0x11d   : > { %1215 = vmatmul.bf16.gmra.mxu2 %v1856_v56  ;;  %v1940_v56 = vor.u32 %v2096_v47, %v1939_v46 }
 0x128   : > { %v1003_v3 = vpop.f32.mrf.mxu0 }
 0x129   : > { %v1092_v6 = vpop.f32.mrf.mxu1 }
 0x12a   : > { %v1093_v7 = vadd.f32 %v1092_v6, %v1003_v3 }
 0x12b   : > { %1042 = vmatmul.bf16.gmra.mxu0 %v1860_v1  ;;  %1240 = vmatmul.bf16.vlgmr.msra.gmra.mxu3 %v1916_v2  ;;  %v454_v1 = vld [vmem:[#allocation2 + $0x50] sm:$0xff] }
 0x12c   : > { %1131 = vmatmul.bf16.gmra.mxu1 %v1864_v4 }
 0x12d   : > { %1220 = vmatmul.bf16.gmra.mxu2 %v1868_v5 }
 0x12e   : > { %v2733_v8 = vpop.f32.mrf.mxu3 }
 0x130   : > { %v1181_v10 = vpop.f32.mrf.mxu2  ;;  %v1005_v12 = vpop.f32.mrf.mxu0 }
 0x131   : > { %v1182_v11 = vadd.f32 %v1181_v10, %v1093_v7  ;;  %v1094_v13 = vpop.f32.mrf.mxu1  ;;  %v1895_v7 = vld [vmem:[%s2594_s7 + $0x108] sm:$0xf]  ;;  %v2085_v10 = vld [vmem:[%s2594_s7 + $0x10c] sm:$0xf] }
 0x132   : > { %v1095_v23 = vadd.f32 %v1094_v13, %v1005_v12  ;;  %v2099_v12 = vld [vmem:[%s2594_s7 + $0x178] sm:$0xf0]  ;;  %v1897_v13 = vld [vmem:[%s2594_s7 + $0x114] sm:$0xf0] }
 0x133   : > { %v1261_v14 = vadd.f32 %v1182_v11, %v450_v9  ;;  %v2086_v9 = vld [vmem:[%s2594_s7 + $0x110] sm:$0xf0]  ;;  %v1951_v11 = vld [vmem:[%s2594_s7 + $0x170] sm:$0xf] }
 0x134   : > { %v1896_v20 = vor.u32 %v2086_v9, %v1895_v7  ;;  %v1952_v21 = vor.u32 %v2099_v12, %v1951_v11  ;;  %v461_v11 = vld [vmem:[#allocation2 + $0xb8] sm:$0xff] }
 0x135   : > { %1293 = vst [vmem:[#allocation2 + $0xb0] sm:$0xff] %v1261_v14  ;;  %v1903_v14 = vld [vmem:[%s2594_s7 + $0x110] sm:$0xf] }
 0x136   : > { %v2743_v25 = vpop.f32.mrf.mxu3 }
 0x138   : > { %v1183_v24 = vpop.f32.mrf.mxu2  ;;  %v1008_v30 = vpop.f32.mrf.mxu0 }
 0x139   : > { %v1184_v29 = vadd.f32 %v1183_v24, %v1095_v23  ;;  %v1097_v33 = vpop.f32.mrf.mxu1  ;;  %v1904_v24 = vor.u32 %v2087_v15, %v1903_v14 }
 0x13a   : > { %v1098_v35 = vadd.f32 %v1097_v33, %v1008_v30 }
 0x13b   : > { %v1262_v34 = vadd.f32 %v1184_v29, %v451_v26  ;;  %1047 = vmatmul.bf16.gmra.mxu0 %v1872_v27  ;;  %1245 = vmatmul.bf16.gmra.mxu3 %v1928_v28  ;;  %v1900_v26 = vor.u32 %v2085_v10, %v1897_v13 }
 0x13c   : > { %1136 = vmatmul.bf16.gmra.mxu1 %v1876_v31  ;;  %v456_v31 = vld [vmem:[#allocation2 + $0x30] sm:$0xff] }
 0x13d   : > { %1294 = vst [vmem:[#allocation2] sm:$0xff] %v1262_v34  ;;  %1225 = vmatmul.bf16.gmra.mxu2 %v1880_v32 }
 0x13e   : > { %v2745_v36 = vpop.f32.mrf.mxu3 }
 0x140   : > { %v1186_v38 = vpop.f32.mrf.mxu2  ;;  %v1010_v40 = vpop.f32.mrf.mxu0 }
 0x141   : > { %v1187_v39 = vadd.f32 %v1186_v38, %v1098_v35  ;;  %v1099_v41 = vpop.f32.mrf.mxu1 }
 0x142   : > { %v1100_v51 = vadd.f32 %v1099_v41, %v1010_v40  ;;  %v457_v40 = vld [vmem:[#allocation2 + $0x48] sm:$0xff] }
 0x143   : > { %v1263_v42 = vadd.f32 %v1187_v39, %v452_v37 }
 0x145   : > { %1295 = vst [vmem:[#allocation2 + $0xd8] sm:$0xff] %v1263_v42 }
 0x146   : > { %v2755_v52 = vpop.f32.mrf.mxu3 }
 0x148   : > { %v1188_v54 = vpop.f32.mrf.mxu2  ;;  %v1013_v58 = vpop.f32.mrf.mxu0 }
 0x149   : > { %v1189_v57 = vadd.f32 %v1188_v54, %v1100_v51  ;;  %v1102_v61 = vpop.f32.mrf.mxu1 }
 0x14a   : > { %v1103_v63 = vadd.f32 %v1102_v61, %v1013_v58 }
 0x14b   : > { %v1264_v62 = vadd.f32 %v1189_v57, %v453_v53  ;;  %1052 = vmatmul.bf16.gmra.mxu0 %v1884_v55  ;;  %1250 = vmatmul.bf16.gmra.mxu3 %v1940_v56  ;;  %v459_v57 = vld [vmem:[#allocation2 + $0x88] sm:$0xff] }
 0x14c   : > { %1141 = vmatmul.bf16.gmra.mxu1 %v1888_v59 }
 0x14d   : > { %1296 = vst [vmem:[#allocation2 + $0x18] sm:$0xff] %v1264_v62  ;;  %1230 = vmatmul.bf16.gmra.mxu2 %v1892_v60 }
 0x14e   : > { %v2757_v0 = vpop.f32.mrf.mxu3 }
 0x150   : > { %v1191_v2 = vpop.f32.mrf.mxu2  ;;  %v1015_v4 = vpop.f32.mrf.mxu0 }
 0x151   : > { %v1192_v3 = vadd.f32 %v1191_v2, %v1103_v63  ;;  %v1104_v5 = vpop.f32.mrf.mxu1  ;;  %v460_v2 = vld [vmem:[#allocation2 + $0xe8] sm:$0xff] }
 0x152   : > { %v1105_v16 = vadd.f32 %v1104_v5, %v1015_v4 }
 0x153   : > { %v1265_v6 = vadd.f32 %v1192_v3, %v454_v1 }
 0x155   : > { %1297 = vst [vmem:[#allocation2 + $0x50] sm:$0xff] %v1265_v6 }
 0x156   : > { %v2767_v17 = vpop.f32.mrf.mxu3 }
 0x158   : > { %v1193_v19 = vpop.f32.mrf.mxu2  ;;  %v1018_v23 = vpop.f32.mrf.mxu0 }
 0x159   : > { %v1194_v22 = vadd.f32 %v1193_v19, %v1105_v16  ;;  %v1107_v27 = vpop.f32.mrf.mxu1 }
 0x15a   : > { %v1108_v29 = vadd.f32 %v1107_v27, %v1018_v23 }
 0x15b   : > { %v1266_v28 = vadd.f32 %v1194_v22, %v455_v18  ;;  %1057 = vmatmul.bf16.gmra.mxu0 %v1896_v20  ;;  %1255 = vmatmul.bf16.gmra.mxu3 %v1952_v21  ;;  %v462_v20 = vld [vmem:[#allocation2 + $0x60] sm:$0xff] }
 0x15c   : > { %1146 = vmatmul.bf16.gmra.mxu1 %v1900_v26 }
 0x15d   : > { %1298 = vst [vmem:[#allocation2 + $0x68] sm:$0xff] %v1266_v28  ;;  %1235 = vmatmul.bf16.gmra.mxu2 %v1904_v24 }
 0x15e   : > { %v2769_v30 = vpop.f32.mrf.mxu3 }
 0x160   : > { %v1196_v32 = vpop.f32.mrf.mxu2  ;;  %v1020_v34 = vpop.f32.mrf.mxu0 }
 0x161   : > { %v1197_v33 = vadd.f32 %v1196_v32, %v1108_v29  ;;  %v1109_v35 = vpop.f32.mrf.mxu1  ;;  %v463_v29 = vld [vmem:[#allocation2 + $0xf0] sm:$0xff] }
 0x162   : > { %v1110_v38 = vadd.f32 %v1109_v35, %v1020_v34 }
 0x163   : > { %v1267_v37 = vadd.f32 %v1197_v33, %v456_v31 }
 0x165   : > { %1299 = vst [vmem:[#allocation2 + $0x30] sm:$0xff] %v1267_v37 }
 0x166   : > { %v2771_v39 = vpop.f32.mrf.mxu3 }
 0x168   : > { %v1198_v41 = vpop.f32.mrf.mxu2  ;;  %v1023_v43 = vpop.f32.mrf.mxu0 }
 0x169   : > { %v1199_v42 = vadd.f32 %v1198_v41, %v1110_v38  ;;  %v1112_v44 = vpop.f32.mrf.mxu1 }
 0x16a   : > { %v1113_v46 = vadd.f32 %v1112_v44, %v1023_v43 }
 0x16b   : > { %v1268_v45 = vadd.f32 %v1199_v42, %v457_v40  ;;  %v464_v40 = vld [vmem:[#allocation2 + $0x8] sm:$0xff] }
 0x16d   : > { %1300 = vst [vmem:[#allocation2 + $0x48] sm:$0xff] %v1268_v45 }
 0x16e   : > { %v2773_v47 = vpop.f32.mrf.mxu3 }
 0x170   : > { %v1201_v49 = vpop.f32.mrf.mxu2  ;;  %v1025_v51 = vpop.f32.mrf.mxu0 }
 0x171   : > { %v1202_v50 = vadd.f32 %v1201_v49, %v1113_v46  ;;  %v1114_v53 = vpop.f32.mrf.mxu1  ;;  %v465_v49 = vld [vmem:[#allocation2 + $0x78] sm:$0xff] }
 0x172   : > { %v1115_v55 = vadd.f32 %v1114_v53, %v1025_v51 }
 0x173   : > { %v1269_v54 = vadd.f32 %v1202_v50, %v458_v48 }
 0x175   : > { %1301 = vst [vmem:[#allocation2 + $0x80] sm:$0xff] %v1269_v54 }
 0x176   : > { %v2775_v56 = vpop.f32.mrf.mxu3 }
 0x178   : > { %v1203_v58 = vpop.f32.mrf.mxu2  ;;  %v1028_v60 = vpop.f32.mrf.mxu0 }
 0x179   : > { %v1204_v59 = vadd.f32 %v1203_v58, %v1115_v55  ;;  %v1117_v61 = vpop.f32.mrf.mxu1  ;;  %v1153_v58 = vadd.f32 %v2773_v47, %v2733_v8 }
 0x17a   : > { %v1118_v63 = vadd.f32 %v1117_v61, %v1028_v60  ;;  %v466_v61 = vld [vmem:[#allocation2 + $0x38] sm:$0xff] }
 0x17b   : > { %v1270_v62 = vadd.f32 %v1204_v59, %v459_v57  ;;  %v474_v59 = vld [vmem:[#allocation2 + $0xa8] sm:$0xff] }
 0x17d   : > { %1302 = vst [vmem:[#allocation2 + $0x88] sm:$0xff] %v1270_v62 }
 0x17e   : > { %v2777_v1 = vpop.f32.mrf.mxu3 }
 0x180   : > { %v1206_v3 = vpop.f32.mrf.mxu2  ;;  %v1030_v5 = vpop.f32.mrf.mxu0 }
 0x181   : > { %v1207_v4 = vadd.f32 %v1206_v3, %v1118_v63  ;;  %v1119_v6 = vpop.f32.mrf.mxu1 }
 0x182   : > { %v1120_v9 = vadd.f32 %v1119_v6, %v1030_v5 }
 0x183   : > { %v1271_v7 = vadd.f32 %v1207_v4, %v460_v2 }
 0x185   : > { %1303 = vst [vmem:[#allocation2 + $0xe8] sm:$0xff] %v1271_v7  ;;  %v1155_v7 = vadd.f32 %v2775_v56, %v2743_v25  ;;  %v468_v25 = vld [vmem:[#allocation2 + $0x40] sm:$0xff] }
 0x186   : > { %v2779_v10 = vpop.f32.mrf.mxu3 }
 0x188   : > { %v1208_v12 = vpop.f32.mrf.mxu2  ;;  %v1033_v14 = vpop.f32.mrf.mxu0 }
 0x189   : > { %v1209_v13 = vadd.f32 %v1208_v12, %v1120_v9  ;;  %v1122_v15 = vpop.f32.mrf.mxu1 }
 0x18a   : > { %v1123_v18 = vadd.f32 %v1122_v15, %v1033_v14 }
 0x18b   : > { %v1272_v16 = vadd.f32 %v1209_v13, %v461_v11  ;;  %v475_v11 = vld [vmem:[#allocation2 + $0xd0] sm:$0xff]  ;;  %v467_v13 = vld [vmem:[#allocation2 + $0x58] sm:$0xff] }
 0x18d   : > { %1304 = vst [vmem:[#allocation2 + $0xb8] sm:$0xff] %v1272_v16 }
 0x18e   : > { %v2781_v19 = vpop.f32.mrf.mxu3 }
 0x190   : > { %v1211_v21 = vpop.f32.mrf.mxu2  ;;  %v1035_v23 = vpop.f32.mrf.mxu0 }
 0x191   : > { %v1212_v22 = vadd.f32 %v1211_v21, %v1123_v18  ;;  %v1124_v26 = vpop.f32.mrf.mxu1 }
 0x192   : > { %v1125_v27 = vadd.f32 %v1124_v26, %v1035_v23  ;;  %v476_v23 = vld [vmem:[#allocation2 + $0x10] sm:$0xff] }
 0x193   : > { %v1273_v24 = vadd.f32 %v1212_v22, %v462_v20  ;;  %v1158_v22 = vadd.f32 %v2777_v1, %v2745_v36 }
 0x195   : > { %1305 = vst [vmem:[#allocation2 + $0x60] sm:$0xff] %v1273_v24 }
 0x196   : > { %v2783_v28 = vpop.f32.mrf.mxu3 }
 0x198   : > { %v1213_v31 = vpop.f32.mrf.mxu2  ;;  %v1038_v33 = vpop.f32.mrf.mxu0 }
 0x199   : > { %v1214_v32 = vadd.f32 %v1213_v31, %v1125_v27  ;;  %v1127_v34 = vpop.f32.mrf.mxu1 }
 0x19a   : > { %v1128_v37 = vadd.f32 %v1127_v34, %v1038_v33  ;;  %v1160_v34 = vadd.f32 %v2779_v10, %v2755_v52  ;;  %v470_v52 = vld [vmem:[#allocation2 + $0xe0] sm:$0xff] }
 0x19b   : > { %v1274_v35 = vadd.f32 %v1214_v32, %v463_v29 }
 0x19d   : > { %1306 = vst [vmem:[#allocation2 + $0xf0] sm:$0xff] %v1274_v35 }
 0x19e   : > { %v2785_v38 = vpop.f32.mrf.mxu3 }
 0x1a0   : > { %v1216_v41 = vpop.f32.mrf.mxu2  ;;  %v1040_v43 = vpop.f32.mrf.mxu0 }
 0x1a1   : > { %v1217_v42 = vadd.f32 %v1216_v41, %v1128_v37  ;;  %v1129_v44 = vpop.f32.mrf.mxu1  ;;  %v477_v37 = vld [vmem:[#allocation2 + $0x28] sm:$0xff] }
 0x1a2   : > { %v1130_v46 = vadd.f32 %v1129_v44, %v1040_v43  ;;  %v469_v41 = vld [vmem:[#allocation2 + $0xc8] sm:$0xff] }
 0x1a3   : > { %v1275_v45 = vadd.f32 %v1217_v42, %v464_v40 }
 0x1a5   : > { %1307 = vst [vmem:[#allocation2 + $0x8] sm:$0xff] %v1275_v45 }
 0x1a6   : > { %v2787_v48 = vpop.f32.mrf.mxu3 }
 0x1a8   : > { %v1218_v50 = vpop.f32.mrf.mxu2  ;;  %v1043_v53 = vpop.f32.mrf.mxu0 }
 0x1a9   : > { %v1219_v51 = vadd.f32 %v1218_v50, %v1130_v46  ;;  %v1132_v54 = vpop.f32.mrf.mxu1  ;;  %v1163_v50 = vadd.f32 %v2781_v19, %v2757_v0 }
 0x1aa   : > { %v1133_v57 = vadd.f32 %v1132_v54, %v1043_v53 }
 0x1ab   : > { %v1276_v55 = vadd.f32 %v1219_v51, %v465_v49  ;;  %v478_v51 = vld [vmem:[#allocation2 + $0xa0] sm:$0xff] }
 0x1ad   : > { %1308 = vst [vmem:[#allocation2 + $0x78] sm:$0xff] %v1276_v55 }
 0x1ae   : > { %v1241_v60 = vpop.f32.mrf.mxu3 }
 0x1af   : > { %v1242_v63 = vadd.f32 %v1241_v60, %v1153_v58 }
 0x1b0   : > { %v1221_v62 = vpop.f32.mrf.mxu2  ;;  %v1045_v3 = vpop.f32.mrf.mxu0 }
 0x1b1   : > { %v1222_v2 = vadd.f32 %v1221_v62, %v1133_v57  ;;  %v1285_v4 = vadd.f32 %v1242_v63, %v474_v59  ;;  %v1134_v5 = vpop.f32.mrf.mxu1  ;;  %v479_v63 = vld [vmem:[#allocation2 + $0xf8] sm:$0xff] }
 0x1b2   : > { %v1135_v9 = vadd.f32 %v1134_v5, %v1045_v3  ;;  %v471_v3 = vld [vmem:[#allocation2 + $0x90] sm:$0xff] }
 0x1b3   : > { %v1277_v6 = vadd.f32 %v1222_v2, %v466_v61  ;;  %1317 = vst [vmem:[#allocation2 + $0xa8] sm:$0xff] %v1285_v4  ;;  %v1165_v61 = vadd.f32 %v2783_v28, %v2767_v17  ;;  %v472_v17 = vld [vmem:[#allocation2 + $0x70] sm:$0xff] }
 0x1b5   : > { %1309 = vst [vmem:[#allocation2 + $0x38] sm:$0xff] %v1277_v6 }
 0x1b6   : > { %v1243_v12 = vpop.f32.mrf.mxu3 }
 0x1b7   : > { %v1244_v47 = vadd.f32 %v1243_v12, %v1155_v7  ;;  %v1168_v12 = vadd.f32 %v2785_v38, %v2769_v30 }
 0x1b8   : > { %v1223_v8 = vpop.f32.mrf.mxu2  ;;  %v1048_v15 = vpop.f32.mrf.mxu0 }
 0x1b9   : > { %v1224_v14 = vadd.f32 %v1223_v8, %v1135_v9  ;;  %v1286_v16 = vadd.f32 %v1244_v47, %v475_v11  ;;  %v1137_v18 = vpop.f32.mrf.mxu1 }
 0x1ba   : > { %v1138_v21 = vadd.f32 %v1137_v18, %v1048_v15 }
 0x1bb   : > { %v1278_v20 = vadd.f32 %v1224_v14, %v467_v13  ;;  %1318 = vst [vmem:[#allocation2 + $0xd0] sm:$0xff] %v1286_v16  ;;  %v480_v13 = vld [vmem:[#allocation2 + $0x20] sm:$0xff] }
 0x1bd   : > { %1310 = vst [vmem:[#allocation2 + $0x58] sm:$0xff] %v1278_v20 }
 0x1be   : > { %v1246_v26 = vpop.f32.mrf.mxu3 }
 0x1bf   : > { %v1247_v24 = vadd.f32 %v1246_v26, %v1158_v22 }
 0x1c0   : > { %v1226_v56 = vpop.f32.mrf.mxu2  ;;  %v1050_v29 = vpop.f32.mrf.mxu0 }
 0x1c1   : > { %v1227_v27 = vadd.f32 %v1226_v56, %v1138_v21  ;;  %v1287_v31 = vadd.f32 %v1247_v24, %v476_v23  ;;  %v1139_v32 = vpop.f32.mrf.mxu1  ;;  %v1170_v21 = vadd.f32 %v2787_v48, %v2771_v39  ;;  %v481_v23 = vld [vmem:[#allocation2 + $0x98] sm:$0xff] }
 0x1c2   : > { %v1140_v35 = vadd.f32 %v1139_v32, %v1050_v29 }
 0x1c3   : > { %v1279_v33 = vadd.f32 %v1227_v27, %v468_v25  ;;  %1319 = vst [vmem:[#allocation2 + $0x10] sm:$0xff] %v1287_v31  ;;  %v473_v25 = vld [vmem:[#allocation2 + $0xc0] sm:$0xff] }
 0x1c5   : > { %1311 = vst [vmem:[#allocation2 + $0x40] sm:$0xff] %v1279_v33 }
 0x1c6   : > { %v1248_v40 = vpop.f32.mrf.mxu3 }
 0x1c7   : > { %v1249_v1 = vadd.f32 %v1248_v40, %v1160_v34 }
 0x1c8   : > { %v1228_v36 = vpop.f32.mrf.mxu2  ;;  %v1053_v43 = vpop.f32.mrf.mxu0 }
 0x1c9   : > { %v1229_v42 = vadd.f32 %v1228_v36, %v1140_v35  ;;  %v1288_v44 = vadd.f32 %v1249_v1, %v477_v37  ;;  %v1142_v45 = vpop.f32.mrf.mxu1 }
 0x1ca   : > { %v1143_v49 = vadd.f32 %v1142_v45, %v1053_v43 }
 0x1cb   : > { %v1280_v46 = vadd.f32 %v1229_v42, %v469_v41  ;;  %1320 = vst [vmem:[#allocation2 + $0x28] sm:$0xff] %v1288_v44 }
 0x1cd   : > { %1312 = vst [vmem:[#allocation2 + $0xc8] sm:$0xff] %v1280_v46 }
 0x1ce   : > { %v1251_v53 = vpop.f32.mrf.mxu3 }
 0x1cf   : > { %v1252_v54 = vadd.f32 %v1251_v53, %v1163_v50 }
 0x1d0   : > { %v1231_v10 = vpop.f32.mrf.mxu2  ;;  %v1055_v57 = vpop.f32.mrf.mxu0 }
 0x1d1   : > { %v1232_v55 = vadd.f32 %v1231_v10, %v1143_v49  ;;  %v1289_v58 = vadd.f32 %v1252_v54, %v478_v51  ;;  %v1144_v59 = vpop.f32.mrf.mxu1 }
 0x1d2   : > { %v1145_v62 = vadd.f32 %v1144_v59, %v1055_v57 }
 0x1d3   : > { %v1281_v60 = vadd.f32 %v1232_v55, %v470_v52  ;;  %1321 = vst [vmem:[#allocation2 + $0xa0] sm:$0xff] %v1289_v58 }
 0x1d5   : > { %1313 = vst [vmem:[#allocation2 + $0xe0] sm:$0xff] %v1281_v60 }
 0x1d6   : > { %v1253_v2 = vpop.f32.mrf.mxu3 }
 0x1d7   : > { %v1254_v19 = vadd.f32 %v1253_v2, %v1165_v61 }
 0x1d8   : > { %v1233_v0 = vpop.f32.mrf.mxu2  ;;  %v1058_v6 = vpop.f32.mrf.mxu0 }
 0x1d9   : > { %v1234_v4 = vadd.f32 %v1233_v0, %v1145_v62  ;;  %v1290_v5 = vadd.f32 %v1254_v19, %v479_v63  ;;  %v1147_v7 = vpop.f32.mrf.mxu1 }
 0x1da   : > { %v1148_v11 = vadd.f32 %v1147_v7, %v1058_v6 }
 0x1db   : > { %v1282_v9 = vadd.f32 %v1234_v4, %v471_v3  ;;  %1322 = vst [vmem:[#allocation2 + $0xf8] sm:$0xff] %v1290_v5 }
 0x1dd   : > { %1314 = vst [vmem:[#allocation2 + $0x90] sm:$0xff] %v1282_v9 }
 0x1de   : > { %v1256_v8 = vpop.f32.mrf.mxu3 }
 0x1df   : > { %v1257_v47 = vadd.f32 %v1256_v8, %v1168_v12 }
 0x1e0   : > { %v1236_v28 = vpop.f32.mrf.mxu2  ;;  %v1060_v18 = vpop.f32.mrf.mxu0 }
 0x1e1   : > { %v1237_v14 = vadd.f32 %v1236_v28, %v1148_v11  ;;  %v1291_v15 = vadd.f32 %v1257_v47, %v480_v13  ;;  %v1149_v20 = vpop.f32.mrf.mxu1 }
 0x1e2   : > { %v1150_v22 = vadd.f32 %v1149_v20, %v1060_v18 }
 0x1e3   : > { %v1283_v16 = vadd.f32 %v1237_v14, %v472_v17  ;;  %1323 = vst [vmem:[#allocation2 + $0x20] sm:$0xff] %v1291_v15 }
 0x1e5   : > { %1315 = vst [vmem:[#allocation2 + $0x70] sm:$0xff] %v1283_v16 }
 0x1e6   : > { %v1258_v26 = vpop.f32.mrf.mxu3 }
 0x1e7   : > { %v1259_v38 = vadd.f32 %v1258_v26, %v1170_v21 }
 0x1e8   : > { %v1238_v30 = vpop.f32.mrf.mxu2 }
 0x1e9   : > { %v1239_v56 = vadd.f32 %v1238_v30, %v1150_v22  ;;  %v1292_v24 = vadd.f32 %v1259_v38, %v481_v23  ;;  %1328 = sbr.rel (%p2049_p0) target bundleno = 573 (0x23d), region = 62 }
 0x1eb   : > { %v1284_v27 = vadd.f32 %v1239_v56, %v473_v25  ;;  %1324 = vst [vmem:[#allocation2 + $0x98] sm:$0xff] %v1292_v24 }
 0x1ed   : > { %1316 = vst [vmem:[#allocation2 + $0xc0] sm:$0xff] %v1284_v27 }
 0x1ee   : > { %v1329_v29 = vld [vmem:[#allocation2 + $0xb0] sm:$0xff]  ;;  %v1330_v31 = vld [vmem:[#allocation2] sm:$0xff]  ;;  %v1331_v32 = vld [vmem:[#allocation2 + $0xd8] sm:$0xff]  ;;  %vm1531_vm0 = vcmask 1040384  }
 0x1ef   : > { %v2127_v33 = vpack.c.bf16 %v1330_v31, %v1329_v29  ;;  %v1425_v39 = vadd.f32 %v1330_v31, %v1329_v29  ;;  %v1462_v48 = vmul.f32 %v1329_v29, %v1329_v29  ;;  %v1463_v34 = vmul.f32 %v1330_v31, %v1330_v31  ;;  %v1332_v35 = vld [vmem:[#allocation2 + $0x18] sm:$0xff]  ;;  %v1333_v37 = vld [vmem:[#allocation2 + $0x50] sm:$0xff]  ;;  %v1334_v40 = vld [vmem:[#allocation2 + $0x68] sm:$0xff] }
 0x1f0   : > { %v2132_v41 = vpack.c.bf16 %v1332_v35, %v1331_v32  ;;  %v1464_v36 = vmul.f32 %v1331_v32, %v1331_v32  ;;  %v2137_v1 = vpack.c.bf16 %v1334_v40, %v1333_v37  ;;  %v1335_v42 = vld [vmem:[#allocation2 + $0x30] sm:$0xff]  ;;  %v1465_v45 = vmul.f32 %v1332_v35, %v1332_v35  ;;  %v1336_v46 = vld [vmem:[#allocation2 + $0x48] sm:$0xff]  ;;  %v1337_v49 = vld [vmem:[#allocation2 + $0x80] sm:$0xff] }
 0x1f1   : > { %2128 = vst [vmem:[%s2586_s30] sm:$0xff] %v2127_v33   ;;  %v1494_v43 = vadd.f32 %v1463_v34, %v1462_v48  ;;  %v1426_v44 = vadd.f32 %v1425_v39, %v1331_v32  ;;  %v1338_v50 = vld [vmem:[#allocation2 + $0x88] sm:$0xff]  ;;  %v2142_v51 = vpack.c.bf16 %v1336_v46, %v1335_v42  ;;  %v1466_v55 = vmul.f32 %v1333_v37, %v1333_v37  ;;  %v1340_v57 = vld [vmem:[#allocation2 + $0xb8] sm:$0xff]  ;;  %v1341_v58 = vld [vmem:[#allocation2 + $0x60] sm:$0xff] }
 0x1f2   : > { %2204 = vst [vmem:[%s2586_s30 + $0x8] sm:$0xff] %v2132_v41   ;;  %v2147_v53 = vpack.c.bf16 %v1338_v50, %v1337_v49  ;;  %v1339_v52 = vld [vmem:[#allocation2 + $0xe8] sm:$0xff]  ;;  %v2809_v59 = vld [vmem:[#allocation2 + $0xf0] sm:$0xff]  ;;  %v1467_v3 = vmul.f32 %v1334_v40, %v1334_v40  ;;  %v2816_v0 = vld [vmem:[#allocation2 + $0x78] sm:$0xff]  ;;  %v1468_v12 = vmul.f32 %v1335_v42, %v1335_v42  ;;  %v1469_v16 = vmul.f32 %v1336_v46, %v1336_v46 }
 0x1f3   : > { %v1427_v10 = vadd.f32 %v1426_v44, %v1332_v35  ;;  %v1495_v54 = vadd.f32 %v1494_v43, %v1464_v36  ;;  %2205 = vst [vmem:[%s2586_s30 + $0x10] sm:$0xff] %v2137_v1   ;;  %v2152_v60 = vpack.c.bf16 %v1340_v57, %v1339_v52  ;;  %v2157_v61 = vpack.c.bf16 %v2809_v59, %v1341_v58  ;;  %v2813_v62 = vld [vmem:[#allocation2 + $0x8] sm:$0xff]  ;;  %v2818_v19 = vld [vmem:[#allocation2 + $0x38] sm:$0xff]  ;;  %v2827_v7 = vld [vmem:[#allocation2 + $0x40] sm:$0xff] }
 0x1f4   : > { %2206 = vst [vmem:[%s2586_s30 + $0x18] sm:$0xff] %v2142_v51   ;;  %v2820_v4 = vld [vmem:[#allocation2 + $0x58] sm:$0xff]  ;;  %v2162_v5 = vpack.c.bf16 %v2816_v0, %v2813_v62  ;;  %v2830_v13 = vld [vmem:[#allocation2 + $0xc8] sm:$0xff]  ;;  %v2832_v8 = vld [vmem:[#allocation2 + $0xe0] sm:$0xff]  ;;  %v1470_v26 = vmul.f32 %v1337_v49, %v1337_v49  ;;  %v1471_v38 = vmul.f32 %v1338_v50, %v1338_v50  ;;  %v1472_v32 = vmul.f32 %v1339_v52, %v1339_v52 }
 0x1f5   : > { %v1496_v63 = vadd.f32 %v1495_v54, %v1465_v45  ;;  %v1428_v2 = vadd.f32 %v1427_v10, %v1333_v37  ;;  %2207 = vst [vmem:[%s2586_s30 + $0x20] sm:$0xff] %v2147_v53   ;;  %v2167_v6 = vpack.c.bf16 %v2820_v4, %v2818_v19  ;;  %v2834_v17 = vld [vmem:[#allocation2 + $0x90] sm:$0xff]  ;;  %v2172_v28 = vpack.c.bf16 %v2830_v13, %v2827_v7  ;;  %v2844_v20 = vld [vmem:[#allocation2 + $0xc0] sm:$0xff]  ;;  %v1353_v56 = vld [vmem:[#allocation2 + $0xa8] sm:$0xff] }
 0x1f6   : > { %2208 = vst [vmem:[%s2586_s30 + $0x28] sm:$0xff] %v2152_v60   ;;  %v2177_v47 = vpack.c.bf16 %v2834_v17, %v2832_v8  ;;  %v2842_v18 = vld [vmem:[#allocation2 + $0x70] sm:$0xff]  ;;  %v1473_v48 = vmul.f32 %v1340_v57, %v1340_v57  ;;  %v1356_v35 = vld [vmem:[#allocation2 + $0x28] sm:$0xff]  ;;  %v1474_v36 = vmul.f32 %v1341_v58, %v1341_v58  ;;  %v1475_v43 = vmul.f32 %v2809_v59, %v2809_v59  ;;  %v1357_v44 = vld [vmem:[#allocation2 + $0xa0] sm:$0xff] }
 0x1f7   : > { %v1429_v9 = vadd.f32 %v1428_v2, %v1334_v40  ;;  %v1497_v11 = vadd.f32 %v1496_v63, %v1466_v55  ;;  %2209 = vst [vmem:[%s2586_s30 + $0x30] sm:$0xff] %v2157_v61   ;;  %v2182_v21 = vpack.c.bf16 %v2844_v20, %v2842_v18  ;;  %v2851_v24 = vld [vmem:[#allocation2 + $0xd0] sm:$0xff]  ;;  %v1358_v45 = vld [vmem:[#allocation2 + $0xf8] sm:$0xff]  ;;  %v1476_v51 = vmul.f32 %v2813_v62, %v2813_v62  ;;  %v1359_v54 = vld [vmem:[#allocation2 + $0x20] sm:$0xff] }
 0x1f8   : > { %2210 = vst [vmem:[%s2586_s30 + $0x38] sm:$0xff] %v2162_v5   ;;  %v2187_v27 = vpack.c.bf16 %v2851_v24, %v1353_v56  ;;  %v1355_v34 = vld [vmem:[#allocation2 + $0x10] sm:$0xff]  ;;  %v1477_v10 = vmul.f32 %v2816_v0, %v2816_v0  ;;  %v1360_v55 = vld [vmem:[#allocation2 + $0x98] sm:$0xff]  ;;  %v1479_v2 = vmul.f32 %v2820_v4, %v2820_v4  ;;  %v1480_v5 = vmul.f32 %v2827_v7, %v2827_v7 }
 0x1f9   : > { %v1498_v14 = vadd.f32 %v1497_v11, %v1467_v3  ;;  %v1430_v15 = vadd.f32 %v1429_v9, %v1335_v42  ;;  %2211 = vst [vmem:[%s2586_s30 + $0x40] sm:$0xff] %v2167_v6   ;;  %v2192_v37 = vpack.c.bf16 %v1356_v35, %v1355_v34  ;;  %v1481_v9 = vmul.f32 %v2830_v13, %v2830_v13 }
 0x1fa   : > { %2212 = vst [vmem:[%s2586_s30 + $0x48] sm:$0xff] %v2172_v28  }
 0x1fb   : > { %v1431_v22 = vadd.f32 %v1430_v15, %v1336_v46  ;;  %v1499_v23 = vadd.f32 %v1498_v14, %v1468_v12  ;;  %2213 = vst [vmem:[%s2586_s30 + $0x50] sm:$0xff] %v2177_v47   ;;  %v2197_v46 = vpack.c.bf16 %v1358_v45, %v1357_v44 }
 0x1fc   : > { %2214 = vst [vmem:[%s2586_s30 + $0x58] sm:$0xff] %v2182_v21  }
 0x1fd   : > { %v1500_v25 = vadd.f32 %v1499_v23, %v1469_v16  ;;  %v1432_v30 = vadd.f32 %v1431_v22, %v1337_v49  ;;  %2215 = vst [vmem:[%s2586_s30 + $0x60] sm:$0xff] %v2187_v27   ;;  %v1488_v27 = vmul.f32 %v1355_v34, %v1355_v34 }
 0x1fe   : > { %2216 = vst [vmem:[%s2586_s30 + $0x68] sm:$0xff] %v2192_v37  }
 0x1ff   : > { %v1433_v29 = vadd.f32 %v1432_v30, %v1338_v50  ;;  %v1501_v31 = vadd.f32 %v1500_v25, %v1470_v26  ;;  %2217 = vst [vmem:[%s2586_s30 + $0x70] sm:$0xff] %v2197_v46   ;;  %v1486_v26 = vmul.f32 %v1353_v56, %v1353_v56  ;;  %v1487_v30 = vmul.f32 %v2851_v24, %v2851_v24 }
 0x201   : > { %v1502_v33 = vadd.f32 %v1501_v31, %v1471_v38  ;;  %v1434_v39 = vadd.f32 %v1433_v29, %v1339_v52 }
 0x203   : > { %v1435_v40 = vadd.f32 %v1434_v39, %v1340_v57  ;;  %v1503_v41 = vadd.f32 %v1502_v33, %v1472_v32  ;;  %v2202_v57 = vpack.c.bf16 %v1360_v55, %v1359_v54  ;;  %v1489_v32 = vmul.f32 %v1356_v35, %v1356_v35 }
 0x204   : > { %v1490_v39 = vmul.f32 %v1357_v44, %v1357_v44 }
 0x205   : > { %v1504_v1 = vadd.f32 %v1503_v41, %v1473_v48  ;;  %v1436_v42 = vadd.f32 %v1435_v40, %v1341_v58  ;;  %2218 = vst [vmem:[%s2586_s30 + $0x78] sm:$0xff] %v2202_v57  }
 0x207   : > { %v1437_v49 = vadd.f32 %v1436_v42, %v2809_v59  ;;  %v1505_v50 = vadd.f32 %v1504_v1, %v1474_v36  ;;  %v1478_v59 = vmul.f32 %v2818_v19, %v2818_v19  ;;  %v1492_v36 = vmul.f32 %v1359_v54, %v1359_v54 }
 0x208   : > { %v1493_v42 = vmul.f32 %v1360_v55, %v1360_v55 }
 0x209   : > { %v1506_v53 = vadd.f32 %v1505_v50, %v1475_v43  ;;  %v1438_v52 = vadd.f32 %v1437_v49, %v2813_v62 }
 0x20b   : > { %v1439_v58 = vadd.f32 %v1438_v52, %v2816_v0  ;;  %v1507_v60 = vadd.f32 %v1506_v53, %v1476_v51 }
 0x20d   : > { %v1508_v61 = vadd.f32 %v1507_v60, %v1477_v10  ;;  %v1440_v63 = vadd.f32 %v1439_v58, %v2818_v19  ;;  %v1482_v19 = vmul.f32 %v2832_v8, %v2832_v8 }
 0x20f   : > { %v1441_v62 = vadd.f32 %v1440_v63, %v2820_v4  ;;  %v1509_v3 = vadd.f32 %v1508_v61, %v1478_v59  ;;  %v1483_v4 = vmul.f32 %v2834_v17, %v2834_v17 }
 0x211   : > { %v1510_v6 = vadd.f32 %v1509_v3, %v1479_v2  ;;  %v1442_v0 = vadd.f32 %v1441_v62, %v2827_v7  ;;  %v1484_v7 = vmul.f32 %v2842_v18, %v2842_v18 }
 0x213   : > { %v1443_v11 = vadd.f32 %v1442_v0, %v2830_v13  ;;  %v1511_v12 = vadd.f32 %v1510_v6, %v1480_v5  ;;  %v1485_v13 = vmul.f32 %v2844_v20, %v2844_v20 }
 0x215   : > { %v1512_v28 = vadd.f32 %v1511_v12, %v1481_v9  ;;  %v1444_v47 = vadd.f32 %v1443_v11, %v2832_v8 }
 0x217   : > { %v1445_v14 = vadd.f32 %v1444_v47, %v2834_v17  ;;  %v1513_v15 = vadd.f32 %v1512_v28, %v1482_v19 }
 0x219   : > { %v1514_v16 = vadd.f32 %v1513_v15, %v1483_v4  ;;  %v1446_v21 = vadd.f32 %v1445_v14, %v2842_v18 }
 0x21b   : > { %v1447_v22 = vadd.f32 %v1446_v21, %v2844_v20  ;;  %v1515_v23 = vadd.f32 %v1514_v16, %v1484_v7  ;;  %v1491_v20 = vmul.f32 %v1358_v45, %v1358_v45 }
 0x21d   : > { %v1516_v8 = vadd.f32 %v1515_v23, %v1485_v13  ;;  %v1448_v25 = vadd.f32 %v1447_v22, %v1353_v56 }
 0x21f   : > { %v1449_v17 = vadd.f32 %v1448_v25, %v2851_v24  ;;  %v1517_v38 = vadd.f32 %v1516_v8, %v1486_v26 }
 0x221   : > { %v1518_v29 = vadd.f32 %v1517_v38, %v1487_v30  ;;  %v1450_v31 = vadd.f32 %v1449_v17, %v1355_v34 }
 0x223   : > { %v1451_v18 = vadd.f32 %v1450_v31, %v1356_v35  ;;  %v1519_v33 = vadd.f32 %v1518_v29, %v1488_v27 }
 0x225   : > { %v1520_v48 = vadd.f32 %v1519_v33, %v1489_v32  ;;  %v1452_v37 = vadd.f32 %v1451_v18, %v1357_v44 }
 0x227   : > { %v1453_v40 = vadd.f32 %v1452_v37, %v1358_v45  ;;  %v1521_v41 = vadd.f32 %v1520_v48, %v1490_v39 }
 0x229   : > { %v1522_v56 = vadd.f32 %v1521_v41, %v1491_v20  ;;  %v1454_v1 = vadd.f32 %v1453_v40, %v1359_v54 }
 0x22b   : > { %v1455_v43 = vadd.f32 %v1454_v1, %v1360_v55  ;;  %v1523_v46 = vadd.f32 %v1522_v56, %v1492_v36 }
 0x22d   : > { %v1456_v24 = vrot.slane %v1455_v43, 4  ;;  %v1524_v49 = vadd.f32 %v1523_v46, %v1493_v42 }
 0x22f   : > { %v1457_v50 = vadd.f32 %v1456_v24, %v1455_v43  ;;  %v1525_v34 = vrot.slane %v1524_v49, 4 }
 0x231   : > { %v1458_v51 = vrot.slane %v1457_v50, 2  ;;  %v1526_v35 = vadd.f32 %v1525_v34, %v1524_v49 }
 0x233   : > { %v1459_v53 = vadd.f32 %v1458_v51, %v1457_v50  ;;  %v1527_v52 = vrot.slane %v1526_v35, 2 }
 0x235   : > { %v1460_v10 = vrot.slane %v1459_v53, 1  ;;  %v1528_v44 = vadd.f32 %v1527_v52, %v1526_v35 }
 0x237   : > { %v1461_v57 = vadd.f32 %v1460_v10, %v1459_v53  ;;  %v1529_v45 = vrot.slane %v1528_v44, 1 }
 0x239   : > { %v1530_v58 = vadd.f32 %v1529_v45, %v1528_v44 }
 0x23b   : > { %v1532_v60 = vsel %vm1531_vm0, %v1461_v57, %v1530_v58 }
 0x23c   : > { %1533 = vst [vmem:[%s2592_s6] sm:$0x3] %v1532_v60 }
 0x23d PF: > { %s14_s18 = sadd.s32 1, %s2357_s18   ;;  %s2920_s12 = smov %s2337_s13 }
 0x23e   : > { %p11_p1 = scmp.ge.s32.totalorder %s14_s18, 8   ;;  %s2921_s13 = smov %s2431_s25 }
 0x23f   : > { %s2922_s14 = smov %s2349_s16  ;;  %s2923_s15 = smov %s2353_s17 }
 0x240   : > { %s2924_s16 = smov %s2927_s19  ;;  %s2925_s17 = smov %s2931_s20 }
 0x241   :  { %13 = sbr.rel (!%p11_p1) target bundleno = 4 (0x4), region = 118 }

// kernel: basic_block_forward.7
= control target key start
LH: loop header
LB: loop body
LE: loop exit
PB: predicated region body
PF: predicated region fallthrough
CT: control target
= control target key end

     0   :  { %s1631_s0 = inlined_call_operand.vmem [shape: bf16[512,128], index: 0, kind: input, shape index: {}]   ;;  %s1632_s1 = inlined_call_operand.vmem [shape: f32[1,128], index: 1, kind: input, shape index: {}]   ;;  %s1633_s2 = inlined_call_operand.vmem [shape: f32[1,128], index: 2, kind: input, shape index: {}]   ;;  %s1634_s3 = inlined_call_operand.vmem [shape: bf16[512,128], index: 3, kind: input, shape index: {}]   ;;  %s1635_s4 = inlined_call_operand.vmem [shape: bf16[512,128], index: 4, kind: output, shape index: {}]  }
   0x1   :  { %v670_v0 = vld [vmem:[%s1631_s0] sm:$0xff]   ;;  %v1085_v8 = vld [vmem:[%s1631_s0 + $0x8] sm:$0xff]   ;;  %v1086_v10 = vld [vmem:[%s1631_s0 + $0x10] sm:$0xff]  }
   0x2   :  { %v1211_v1 = vld [vmem:[%s1632_s1] ss:$0 sm:$0xff]  ;;  %v671_v2 = vunpack.c.l.bf16 %v670_v0  ;;  %v672_v3 = vunpack.c.h.bf16 %v670_v0  ;;  %v1116_v9 = vld [vmem:[%s1634_s3 + $0x8] sm:$0xff]   ;;  %v675_v13 = vunpack.c.l.bf16 %v1085_v8  ;;  %v676_v14 = vunpack.c.h.bf16 %v1085_v8  ;;  %v1117_v15 = vld [vmem:[%s1634_s3 + $0x10] sm:$0xff]  }
   0x3   :  { %v1216_v4 = vld [vmem:[%s1633_s2] ss:$0 sm:$0xff]  ;;  %v803_v16 = vunpack.c.l.bf16 %v1116_v9  ;;  %v804_v17 = vunpack.c.h.bf16 %v1116_v9  ;;  %v679_v18 = vunpack.c.l.bf16 %v1086_v10  ;;  %v680_v19 = vunpack.c.h.bf16 %v1086_v10  ;;  %v1087_v24 = vld [vmem:[%s1631_s0 + $0x18] sm:$0xff]   ;;  %v1089_v56 = vld [vmem:[%s1631_s0 + $0x28] sm:$0xff]  }
   0x4   :  { %v798_v5 = vld [vmem:[%s1634_s3] sm:$0xff]   ;;  %v149_v11 = vmul.f32 %v1211_v1, %v671_v2  ;;  %v150_v12 = vmul.f32 %v1211_v1, %v672_v3  ;;  %v151_v22 = vmul.f32 %v1211_v1, %v675_v13  ;;  %v152_v23 = vmul.f32 %v1211_v1, %v676_v14  ;;  %v1118_v37 = vld [vmem:[%s1634_s3 + $0x18] sm:$0xff]   ;;  %v1120_v61 = vld [vmem:[%s1634_s3 + $0x28] sm:$0xff]  }
   0x5   :  { %v799_v6 = vunpack.c.l.bf16 %v798_v5  ;;  %v800_v7 = vunpack.c.h.bf16 %v798_v5  ;;  %v153_v25 = vmul.f32 %v1211_v1, %v679_v18  ;;  %v154_v26 = vmul.f32 %v1211_v1, %v680_v19  ;;  %v1088_v46 = vld [vmem:[%s1631_s0 + $0x20] sm:$0xff]   ;;  %v1090_v8 = vld [vmem:[%s1631_s0 + $0x30] sm:$0xff]  }
   0x6   :  { %v217_v20 = vadd.f32 %v1216_v4, %v149_v11  ;;  %v218_v21 = vadd.f32 %v1216_v4, %v150_v12  ;;  %v807_v27 = vunpack.c.l.bf16 %v1117_v15  ;;  %v808_v28 = vunpack.c.h.bf16 %v1117_v15  ;;  %v1119_v51 = vld [vmem:[%s1634_s3 + $0x20] sm:$0xff]   ;;  %v1121_v9 = vld [vmem:[%s1634_s3 + $0x30] sm:$0xff]  }
   0x7   :  { %v219_v31 = vadd.f32 %v1216_v4, %v151_v22  ;;  %v220_v32 = vadd.f32 %v1216_v4, %v152_v23  ;;  %v221_v33 = vadd.f32 %v1216_v4, %v153_v25  ;;  %v222_v34 = vadd.f32 %v1216_v4, %v154_v26  ;;  %v1091_v22 = vld [vmem:[%s1631_s0 + $0x38] sm:$0xff]  }
   0x8   :  { %v409_v29 = vadd.f32 %v799_v6, %v217_v20  ;;  %v410_v30 = vadd.f32 %v800_v7, %v218_v21  ;;  %v683_v35 = vunpack.c.l.bf16 %v1087_v24  ;;  %v684_v36 = vunpack.c.h.bf16 %v1087_v24 }
   0x9   :  { %v411_v40 = vadd.f32 %v803_v16, %v219_v31  ;;  %v412_v41 = vadd.f32 %v804_v17, %v220_v32  ;;  %v413_v42 = vadd.f32 %v807_v27, %v221_v33  ;;  %v414_v43 = vadd.f32 %v808_v28, %v222_v34  ;;  %v1122_v31 = vld [vmem:[%s1634_s3 + $0x38] sm:$0xff]  }
   0xa   :  { %v473_v38 = vmax.f32 %v409_v29, 0.0  ;;  %v474_v39 = vmax.f32 %v410_v30, 0.0  ;;  %v155_v44 = vmul.f32 %v1211_v1, %v683_v35  ;;  %v156_v45 = vmul.f32 %v1211_v1, %v684_v36 }
   0xb   :  { %v475_v48 = vmax.f32 %v411_v40, 0.0  ;;  %v476_v49 = vmax.f32 %v412_v41, 0.0  ;;  %v811_v50 = vunpack.c.l.bf16 %v1118_v37  ;;  %v477_v52 = vmax.f32 %v413_v42, 0.0  ;;  %v1092_v40 = vld [vmem:[%s1631_s0 + $0x40] sm:$0xff]  }
   0xc   :  { %v928_v47 = vpack.c.bf16 %v474_v39, %v473_v38  ;;  %v478_v53 = vmax.f32 %v414_v43, 0.0  ;;  %v223_v54 = vadd.f32 %v1216_v4, %v155_v44  ;;  %v224_v55 = vadd.f32 %v1216_v4, %v156_v45 }
   0xd   :  { %v933_v57 = vpack.c.bf16 %v476_v49, %v475_v48  ;;  %v812_v58 = vunpack.c.h.bf16 %v1118_v37  ;;  %v687_v59 = vunpack.c.l.bf16 %v1088_v46  ;;  %v688_v60 = vunpack.c.h.bf16 %v1088_v46  ;;  %v1123_v49 = vld [vmem:[%s1634_s3 + $0x40] sm:$0xff]  }
   0xe   :  { %929 = vst [vmem:[%s1635_s4] sm:$0xff] %v928_v47   ;;  %v938_v62 = vpack.c.bf16 %v478_v53, %v477_v52  ;;  %v415_v63 = vadd.f32 %v811_v50, %v223_v54  ;;  %v815_v0 = vunpack.c.l.bf16 %v1119_v51  ;;  %v816_v2 = vunpack.c.h.bf16 %v1119_v51  ;;  %v1093_v54 = vld [vmem:[%s1631_s0 + $0x48] sm:$0xff]  }
   0xf   :  { %1147 = vst [vmem:[%s1635_s4 + $0x8] sm:$0xff] %v933_v57   ;;  %v416_v3 = vadd.f32 %v812_v58, %v224_v55  ;;  %v157_v5 = vmul.f32 %v1211_v1, %v687_v59  ;;  %v158_v6 = vmul.f32 %v1211_v1, %v688_v60  ;;  %v691_v7 = vunpack.c.l.bf16 %v1089_v56 }
  0x10   :  { %1148 = vst [vmem:[%s1635_s4 + $0x10] sm:$0xff] %v938_v62   ;;  %v479_v10 = vmax.f32 %v415_v63, 0.0  ;;  %v692_v11 = vunpack.c.h.bf16 %v1089_v56  ;;  %v819_v12 = vunpack.c.l.bf16 %v1120_v61  ;;  %v820_v13 = vunpack.c.h.bf16 %v1120_v61  ;;  %v1124_v63 = vld [vmem:[%s1634_s3 + $0x48] sm:$0xff]  }
  0x11   :  { %v480_v14 = vmax.f32 %v416_v3, 0.0  ;;  %v225_v15 = vadd.f32 %v1216_v4, %v157_v5  ;;  %v226_v16 = vadd.f32 %v1216_v4, %v158_v6  ;;  %v159_v17 = vmul.f32 %v1211_v1, %v691_v7  ;;  %v1094_v6 = vld [vmem:[%s1631_s0 + $0x50] sm:$0xff]  }
  0x12   :  { %v160_v18 = vmul.f32 %v1211_v1, %v692_v11  ;;  %v695_v19 = vunpack.c.l.bf16 %v1090_v8  ;;  %v696_v20 = vunpack.c.h.bf16 %v1090_v8  ;;  %v823_v21 = vunpack.c.l.bf16 %v1121_v9  ;;  %v1125_v11 = vld [vmem:[%s1634_s3 + $0x50] sm:$0xff]  }
  0x13   :  { %v943_v23 = vpack.c.bf16 %v480_v14, %v479_v10  ;;  %v417_v24 = vadd.f32 %v815_v0, %v225_v15  ;;  %v418_v25 = vadd.f32 %v816_v2, %v226_v16  ;;  %v227_v26 = vadd.f32 %v1216_v4, %v159_v17 }
  0x14   :  { %v228_v27 = vadd.f32 %v1216_v4, %v160_v18  ;;  %v161_v28 = vmul.f32 %v1211_v1, %v695_v19  ;;  %v162_v29 = vmul.f32 %v1211_v1, %v696_v20  ;;  %v824_v30 = vunpack.c.h.bf16 %v1121_v9  ;;  %v1095_v20 = vld [vmem:[%s1631_s0 + $0x58] sm:$0xff]  }
  0x15   :  { %1149 = vst [vmem:[%s1635_s4 + $0x18] sm:$0xff] %v943_v23   ;;  %v481_v32 = vmax.f32 %v417_v24, 0.0  ;;  %v482_v33 = vmax.f32 %v418_v25, 0.0  ;;  %v419_v34 = vadd.f32 %v819_v12, %v227_v26  ;;  %v699_v35 = vunpack.c.l.bf16 %v1091_v22 }
  0x16   :  { %v420_v36 = vadd.f32 %v820_v13, %v228_v27  ;;  %v229_v37 = vadd.f32 %v1216_v4, %v161_v28  ;;  %v230_v38 = vadd.f32 %v1216_v4, %v162_v29  ;;  %v700_v39 = vunpack.c.h.bf16 %v1091_v22  ;;  %v1126_v29 = vld [vmem:[%s1634_s3 + $0x58] sm:$0xff]  }
  0x17   :  { %v948_v41 = vpack.c.bf16 %v482_v33, %v481_v32  ;;  %v483_v42 = vmax.f32 %v419_v34, 0.0  ;;  %v163_v43 = vmul.f32 %v1211_v1, %v699_v35  ;;  %v827_v44 = vunpack.c.l.bf16 %v1122_v31 }
  0x18   :  { %v484_v45 = vmax.f32 %v420_v36, 0.0  ;;  %v421_v46 = vadd.f32 %v823_v21, %v229_v37  ;;  %v422_v47 = vadd.f32 %v824_v30, %v230_v38  ;;  %v164_v48 = vmul.f32 %v1211_v1, %v700_v39  ;;  %v1096_v38 = vld [vmem:[%s1631_s0 + $0x60] sm:$0xff]  }
  0x19   :  { %1150 = vst [vmem:[%s1635_s4 + $0x20] sm:$0xff] %v948_v41   ;;  %v231_v50 = vadd.f32 %v1216_v4, %v163_v43  ;;  %v828_v51 = vunpack.c.h.bf16 %v1122_v31  ;;  %v703_v52 = vunpack.c.l.bf16 %v1092_v40  ;;  %v704_v53 = vunpack.c.h.bf16 %v1092_v40  ;;  %v1127_v43 = vld [vmem:[%s1634_s3 + $0x60] sm:$0xff]  }
  0x1a   :  { %v953_v55 = vpack.c.bf16 %v484_v45, %v483_v42  ;;  %v485_v56 = vmax.f32 %v421_v46, 0.0  ;;  %v486_v57 = vmax.f32 %v422_v47, 0.0  ;;  %v232_v58 = vadd.f32 %v1216_v4, %v164_v48 }
  0x1b   :  { %v423_v59 = vadd.f32 %v827_v44, %v231_v50  ;;  %v165_v60 = vmul.f32 %v1211_v1, %v703_v52  ;;  %v166_v61 = vmul.f32 %v1211_v1, %v704_v53  ;;  %v831_v62 = vunpack.c.l.bf16 %v1123_v49  ;;  %v1097_v52 = vld [vmem:[%s1631_s0 + $0x68] sm:$0xff]  }
  0x1c   :  { %1151 = vst [vmem:[%s1635_s4 + $0x28] sm:$0xff] %v953_v55   ;;  %v958_v0 = vpack.c.bf16 %v486_v57, %v485_v56  ;;  %v424_v2 = vadd.f32 %v828_v51, %v232_v58  ;;  %v832_v3 = vunpack.c.h.bf16 %v1123_v49  ;;  %v707_v5 = vunpack.c.l.bf16 %v1093_v54 }
  0x1d   :  { %v487_v7 = vmax.f32 %v423_v59, 0.0  ;;  %v233_v8 = vadd.f32 %v1216_v4, %v165_v60  ;;  %v234_v9 = vadd.f32 %v1216_v4, %v166_v61  ;;  %v708_v10 = vunpack.c.h.bf16 %v1093_v54  ;;  %v1128_v61 = vld [vmem:[%s1634_s3 + $0x68] sm:$0xff]  }
  0x1e   :  { %1152 = vst [vmem:[%s1635_s4 + $0x30] sm:$0xff] %v958_v0   ;;  %v488_v12 = vmax.f32 %v424_v2, 0.0  ;;  %v167_v13 = vmul.f32 %v1211_v1, %v707_v5  ;;  %v835_v14 = vunpack.c.l.bf16 %v1124_v63  ;;  %v836_v15 = vunpack.c.h.bf16 %v1124_v63 }
  0x1f   :  { %v425_v16 = vadd.f32 %v831_v62, %v233_v8  ;;  %v426_v17 = vadd.f32 %v832_v3, %v234_v9  ;;  %v168_v18 = vmul.f32 %v1211_v1, %v708_v10  ;;  %v711_v19 = vunpack.c.l.bf16 %v1094_v6  ;;  %v1098_v3 = vld [vmem:[%s1631_s0 + $0x70] sm:$0xff]  }
  0x20   :  { %v963_v21 = vpack.c.bf16 %v488_v12, %v487_v7  ;;  %v235_v22 = vadd.f32 %v1216_v4, %v167_v13  ;;  %v712_v23 = vunpack.c.h.bf16 %v1094_v6  ;;  %v839_v24 = vunpack.c.l.bf16 %v1125_v11  ;;  %v1129_v13 = vld [vmem:[%s1634_s3 + $0x70] sm:$0xff]  }
  0x21   :  { %v489_v25 = vmax.f32 %v425_v16, 0.0  ;;  %v490_v26 = vmax.f32 %v426_v17, 0.0  ;;  %v236_v27 = vadd.f32 %v1216_v4, %v168_v18  ;;  %v169_v28 = vmul.f32 %v1211_v1, %v711_v19 }
  0x22   :  { %1153 = vst [vmem:[%s1635_s4 + $0x38] sm:$0xff] %v963_v21   ;;  %v427_v30 = vadd.f32 %v835_v14, %v235_v22  ;;  %v170_v31 = vmul.f32 %v1211_v1, %v712_v23  ;;  %v840_v32 = vunpack.c.h.bf16 %v1125_v11  ;;  %v715_v33 = vunpack.c.l.bf16 %v1095_v20  ;;  %v1099_v22 = vld [vmem:[%s1631_s0 + $0x78] sm:$0xff]  }
  0x23   :  { %v968_v34 = vpack.c.bf16 %v490_v26, %v489_v25  ;;  %v428_v35 = vadd.f32 %v836_v15, %v236_v27  ;;  %v237_v36 = vadd.f32 %v1216_v4, %v169_v28  ;;  %v716_v37 = vunpack.c.h.bf16 %v1095_v20  ;;  %v1130_v27 = vld [vmem:[%s1634_s3 + $0x78] sm:$0xff]  }
  0x24   :  { %v491_v39 = vmax.f32 %v427_v30, 0.0  ;;  %v238_v40 = vadd.f32 %v1216_v4, %v170_v31  ;;  %v171_v41 = vmul.f32 %v1211_v1, %v715_v33  ;;  %v843_v42 = vunpack.c.l.bf16 %v1126_v29 }
  0x25   :  { %1154 = vst [vmem:[%s1635_s4 + $0x40] sm:$0xff] %v968_v34   ;;  %v492_v44 = vmax.f32 %v428_v35, 0.0  ;;  %v429_v45 = vadd.f32 %v839_v24, %v237_v36  ;;  %v172_v46 = vmul.f32 %v1211_v1, %v716_v37  ;;  %v844_v47 = vunpack.c.h.bf16 %v1126_v29  ;;  %v1100_v36 = vld [vmem:[%s1631_s0 + $0x80] sm:$0xff]  }
  0x26   :  { %v430_v48 = vadd.f32 %v840_v32, %v238_v40  ;;  %v239_v49 = vadd.f32 %v1216_v4, %v171_v41  ;;  %v719_v50 = vunpack.c.l.bf16 %v1096_v38  ;;  %v720_v51 = vunpack.c.h.bf16 %v1096_v38  ;;  %v1131_v41 = vld [vmem:[%s1634_s3 + $0x80] sm:$0xff]  }
  0x27   :  { %v973_v53 = vpack.c.bf16 %v492_v44, %v491_v39  ;;  %v493_v54 = vmax.f32 %v429_v45, 0.0  ;;  %v240_v55 = vadd.f32 %v1216_v4, %v172_v46  ;;  %v847_v56 = vunpack.c.l.bf16 %v1127_v43 }
  0x28   :  { %v494_v57 = vmax.f32 %v430_v48, 0.0  ;;  %v431_v58 = vadd.f32 %v843_v42, %v239_v49  ;;  %v173_v59 = vmul.f32 %v1211_v1, %v719_v50  ;;  %v174_v60 = vmul.f32 %v1211_v1, %v720_v51  ;;  %v1101_v50 = vld [vmem:[%s1631_s0 + $0x88] sm:$0xff]  }
  0x29   :  { %1155 = vst [vmem:[%s1635_s4 + $0x48] sm:$0xff] %v973_v53   ;;  %v432_v62 = vadd.f32 %v844_v47, %v240_v55  ;;  %v848_v63 = vunpack.c.h.bf16 %v1127_v43  ;;  %v723_v0 = vunpack.c.l.bf16 %v1097_v52  ;;  %v724_v2 = vunpack.c.h.bf16 %v1097_v52  ;;  %v1132_v55 = vld [vmem:[%s1634_s3 + $0x88] sm:$0xff]  }
  0x2a   :  { %v978_v5 = vpack.c.bf16 %v494_v57, %v493_v54  ;;  %v495_v6 = vmax.f32 %v431_v58, 0.0  ;;  %v241_v7 = vadd.f32 %v1216_v4, %v173_v59  ;;  %v242_v8 = vadd.f32 %v1216_v4, %v174_v60 }
  0x2b   :  { %v496_v9 = vmax.f32 %v432_v62, 0.0  ;;  %v175_v10 = vmul.f32 %v1211_v1, %v723_v0  ;;  %v176_v11 = vmul.f32 %v1211_v1, %v724_v2  ;;  %v851_v12 = vunpack.c.l.bf16 %v1128_v61  ;;  %v1102_v0 = vld [vmem:[%s1631_s0 + $0x90] sm:$0xff]  }
  0x2c   :  { %1156 = vst [vmem:[%s1635_s4 + $0x50] sm:$0xff] %v978_v5   ;;  %v433_v14 = vadd.f32 %v847_v56, %v241_v7  ;;  %v434_v15 = vadd.f32 %v848_v63, %v242_v8  ;;  %v852_v16 = vunpack.c.h.bf16 %v1128_v61  ;;  %v727_v17 = vunpack.c.l.bf16 %v1098_v3 }
  0x2d   :  { %v983_v18 = vpack.c.bf16 %v496_v9, %v495_v6  ;;  %v243_v19 = vadd.f32 %v1216_v4, %v175_v10  ;;  %v244_v20 = vadd.f32 %v1216_v4, %v176_v11  ;;  %v728_v21 = vunpack.c.h.bf16 %v1098_v3  ;;  %v1133_v11 = vld [vmem:[%s1634_s3 + $0x90] sm:$0xff]  }
  0x2e   :  { %v497_v23 = vmax.f32 %v433_v14, 0.0  ;;  %v498_v24 = vmax.f32 %v434_v15, 0.0  ;;  %v177_v25 = vmul.f32 %v1211_v1, %v727_v17  ;;  %v855_v26 = vunpack.c.l.bf16 %v1129_v13 }
  0x2f   :  { %1157 = vst [vmem:[%s1635_s4 + $0x58] sm:$0xff] %v983_v18   ;;  %v435_v28 = vadd.f32 %v851_v12, %v243_v19  ;;  %v436_v29 = vadd.f32 %v852_v16, %v244_v20  ;;  %v178_v30 = vmul.f32 %v1211_v1, %v728_v21  ;;  %v856_v31 = vunpack.c.h.bf16 %v1129_v13  ;;  %v1103_v20 = vld [vmem:[%s1631_s0 + $0x98] sm:$0xff]  }
  0x30   :  { %v988_v32 = vpack.c.bf16 %v498_v24, %v497_v23  ;;  %v245_v33 = vadd.f32 %v1216_v4, %v177_v25  ;;  %v731_v34 = vunpack.c.l.bf16 %v1099_v22  ;;  %v732_v35 = vunpack.c.h.bf16 %v1099_v22  ;;  %v1134_v25 = vld [vmem:[%s1634_s3 + $0x98] sm:$0xff]  }
  0x31   :  { %v499_v37 = vmax.f32 %v435_v28, 0.0  ;;  %v500_v38 = vmax.f32 %v436_v29, 0.0  ;;  %v246_v39 = vadd.f32 %v1216_v4, %v178_v30  ;;  %v859_v40 = vunpack.c.l.bf16 %v1130_v27 }
  0x32   :  { %1158 = vst [vmem:[%s1635_s4 + $0x60] sm:$0xff] %v988_v32   ;;  %v437_v42 = vadd.f32 %v855_v26, %v245_v33  ;;  %v179_v43 = vmul.f32 %v1211_v1, %v731_v34  ;;  %v180_v44 = vmul.f32 %v1211_v1, %v732_v35  ;;  %v860_v45 = vunpack.c.h.bf16 %v1130_v27  ;;  %v1104_v34 = vld [vmem:[%s1631_s0 + $0xa0] sm:$0xff]  }
  0x33   :  { %v993_v46 = vpack.c.bf16 %v500_v38, %v499_v37  ;;  %v438_v47 = vadd.f32 %v856_v31, %v246_v39  ;;  %v735_v48 = vunpack.c.l.bf16 %v1100_v36  ;;  %v736_v49 = vunpack.c.h.bf16 %v1100_v36  ;;  %v1135_v39 = vld [vmem:[%s1634_s3 + $0xa0] sm:$0xff]  }
  0x34   :  { %v501_v51 = vmax.f32 %v437_v42, 0.0  ;;  %v247_v52 = vadd.f32 %v1216_v4, %v179_v43  ;;  %v248_v53 = vadd.f32 %v1216_v4, %v180_v44  ;;  %v863_v54 = vunpack.c.l.bf16 %v1131_v41 }
  0x35   :  { %1159 = vst [vmem:[%s1635_s4 + $0x68] sm:$0xff] %v993_v46   ;;  %v502_v56 = vmax.f32 %v438_v47, 0.0  ;;  %v181_v57 = vmul.f32 %v1211_v1, %v735_v48  ;;  %v182_v58 = vmul.f32 %v1211_v1, %v736_v49  ;;  %v864_v59 = vunpack.c.h.bf16 %v1131_v41  ;;  %v1105_v48 = vld [vmem:[%s1631_s0 + $0xa8] sm:$0xff]  }
  0x36   :  { %v439_v60 = vadd.f32 %v859_v40, %v247_v52  ;;  %v440_v61 = vadd.f32 %v860_v45, %v248_v53  ;;  %v739_v62 = vunpack.c.l.bf16 %v1101_v50  ;;  %v740_v63 = vunpack.c.h.bf16 %v1101_v50  ;;  %v1136_v53 = vld [vmem:[%s1634_s3 + $0xa8] sm:$0xff]  }
  0x37   :  { %v998_v2 = vpack.c.bf16 %v502_v56, %v501_v51  ;;  %v249_v3 = vadd.f32 %v1216_v4, %v181_v57  ;;  %v250_v5 = vadd.f32 %v1216_v4, %v182_v58  ;;  %v867_v6 = vunpack.c.l.bf16 %v1132_v55 }
  0x38   :  { %v503_v7 = vmax.f32 %v439_v60, 0.0  ;;  %v504_v8 = vmax.f32 %v440_v61, 0.0  ;;  %v183_v9 = vmul.f32 %v1211_v1, %v739_v62  ;;  %v184_v10 = vmul.f32 %v1211_v1, %v740_v63  ;;  %v1106_v62 = vld [vmem:[%s1631_s0 + $0xb0] sm:$0xff]  }
  0x39   :  { %1160 = vst [vmem:[%s1635_s4 + $0x70] sm:$0xff] %v998_v2   ;;  %v441_v12 = vadd.f32 %v863_v54, %v249_v3  ;;  %v442_v13 = vadd.f32 %v864_v59, %v250_v5  ;;  %v868_v14 = vunpack.c.h.bf16 %v1132_v55  ;;  %v743_v15 = vunpack.c.l.bf16 %v1102_v0 }
  0x3a   :  { %v1003_v16 = vpack.c.bf16 %v504_v8, %v503_v7  ;;  %v251_v17 = vadd.f32 %v1216_v4, %v183_v9  ;;  %v252_v18 = vadd.f32 %v1216_v4, %v184_v10  ;;  %v744_v19 = vunpack.c.h.bf16 %v1102_v0  ;;  %v1137_v9 = vld [vmem:[%s1634_s3 + $0xb0] sm:$0xff]  }
  0x3b   :  { %v505_v21 = vmax.f32 %v441_v12, 0.0  ;;  %v506_v22 = vmax.f32 %v442_v13, 0.0  ;;  %v185_v23 = vmul.f32 %v1211_v1, %v743_v15  ;;  %v871_v24 = vunpack.c.l.bf16 %v1133_v11 }
  0x3c   :  { %1161 = vst [vmem:[%s1635_s4 + $0x78] sm:$0xff] %v1003_v16   ;;  %v443_v26 = vadd.f32 %v867_v6, %v251_v17  ;;  %v444_v27 = vadd.f32 %v868_v14, %v252_v18  ;;  %v186_v28 = vmul.f32 %v1211_v1, %v744_v19  ;;  %v872_v29 = vunpack.c.h.bf16 %v1133_v11  ;;  %v1107_v18 = vld [vmem:[%s1631_s0 + $0xb8] sm:$0xff]  }
  0x3d   :  { %v1008_v30 = vpack.c.bf16 %v506_v22, %v505_v21  ;;  %v253_v31 = vadd.f32 %v1216_v4, %v185_v23  ;;  %v747_v32 = vunpack.c.l.bf16 %v1103_v20  ;;  %v748_v33 = vunpack.c.h.bf16 %v1103_v20  ;;  %v1138_v23 = vld [vmem:[%s1634_s3 + $0xb8] sm:$0xff]  }
  0x3e   :  { %v507_v35 = vmax.f32 %v443_v26, 0.0  ;;  %v508_v36 = vmax.f32 %v444_v27, 0.0  ;;  %v254_v37 = vadd.f32 %v1216_v4, %v186_v28  ;;  %v875_v38 = vunpack.c.l.bf16 %v1134_v25 }
  0x3f   :  { %1162 = vst [vmem:[%s1635_s4 + $0x80] sm:$0xff] %v1008_v30   ;;  %v445_v40 = vadd.f32 %v871_v24, %v253_v31  ;;  %v187_v41 = vmul.f32 %v1211_v1, %v747_v32  ;;  %v188_v42 = vmul.f32 %v1211_v1, %v748_v33  ;;  %v876_v43 = vunpack.c.h.bf16 %v1134_v25  ;;  %v1108_v32 = vld [vmem:[%s1631_s0 + $0xc0] sm:$0xff]  }
  0x40   :  { %v1013_v44 = vpack.c.bf16 %v508_v36, %v507_v35  ;;  %v446_v45 = vadd.f32 %v872_v29, %v254_v37  ;;  %v751_v46 = vunpack.c.l.bf16 %v1104_v34  ;;  %v752_v47 = vunpack.c.h.bf16 %v1104_v34  ;;  %v1139_v37 = vld [vmem:[%s1634_s3 + $0xc0] sm:$0xff]  }
  0x41   :  { %v509_v49 = vmax.f32 %v445_v40, 0.0  ;;  %v255_v50 = vadd.f32 %v1216_v4, %v187_v41  ;;  %v256_v51 = vadd.f32 %v1216_v4, %v188_v42  ;;  %v879_v52 = vunpack.c.l.bf16 %v1135_v39 }
  0x42   :  { %1163 = vst [vmem:[%s1635_s4 + $0x88] sm:$0xff] %v1013_v44   ;;  %v510_v54 = vmax.f32 %v446_v45, 0.0  ;;  %v189_v55 = vmul.f32 %v1211_v1, %v751_v46  ;;  %v190_v56 = vmul.f32 %v1211_v1, %v752_v47  ;;  %v880_v57 = vunpack.c.h.bf16 %v1135_v39  ;;  %v1109_v46 = vld [vmem:[%s1631_s0 + $0xc8] sm:$0xff]  }
  0x43   :  { %v447_v58 = vadd.f32 %v875_v38, %v255_v50  ;;  %v448_v59 = vadd.f32 %v876_v43, %v256_v51  ;;  %v755_v60 = vunpack.c.l.bf16 %v1105_v48  ;;  %v756_v61 = vunpack.c.h.bf16 %v1105_v48  ;;  %v1140_v51 = vld [vmem:[%s1634_s3 + $0xc8] sm:$0xff]  }
  0x44   :  { %v1018_v63 = vpack.c.bf16 %v510_v54, %v509_v49  ;;  %v257_v0 = vadd.f32 %v1216_v4, %v189_v55  ;;  %v258_v2 = vadd.f32 %v1216_v4, %v190_v56  ;;  %v883_v3 = vunpack.c.l.bf16 %v1136_v53 }
  0x45   :  { %v511_v5 = vmax.f32 %v447_v58, 0.0  ;;  %v512_v6 = vmax.f32 %v448_v59, 0.0  ;;  %v191_v7 = vmul.f32 %v1211_v1, %v755_v60  ;;  %v192_v8 = vmul.f32 %v1211_v1, %v756_v61  ;;  %v1110_v60 = vld [vmem:[%s1631_s0 + $0xd0] sm:$0xff]  }
  0x46   :  { %1164 = vst [vmem:[%s1635_s4 + $0x90] sm:$0xff] %v1018_v63   ;;  %v449_v10 = vadd.f32 %v879_v52, %v257_v0  ;;  %v450_v11 = vadd.f32 %v880_v57, %v258_v2  ;;  %v884_v12 = vunpack.c.h.bf16 %v1136_v53  ;;  %v759_v13 = vunpack.c.l.bf16 %v1106_v62 }
  0x47   :  { %v1023_v14 = vpack.c.bf16 %v512_v6, %v511_v5  ;;  %v259_v15 = vadd.f32 %v1216_v4, %v191_v7  ;;  %v260_v16 = vadd.f32 %v1216_v4, %v192_v8  ;;  %v760_v17 = vunpack.c.h.bf16 %v1106_v62  ;;  %v1141_v7 = vld [vmem:[%s1634_s3 + $0xd0] sm:$0xff]  }
  0x48   :  { %v513_v19 = vmax.f32 %v449_v10, 0.0  ;;  %v514_v20 = vmax.f32 %v450_v11, 0.0  ;;  %v193_v21 = vmul.f32 %v1211_v1, %v759_v13  ;;  %v887_v22 = vunpack.c.l.bf16 %v1137_v9 }
  0x49   :  { %1165 = vst [vmem:[%s1635_s4 + $0x98] sm:$0xff] %v1023_v14   ;;  %v451_v24 = vadd.f32 %v883_v3, %v259_v15  ;;  %v452_v25 = vadd.f32 %v884_v12, %v260_v16  ;;  %v194_v26 = vmul.f32 %v1211_v1, %v760_v17  ;;  %v888_v27 = vunpack.c.h.bf16 %v1137_v9  ;;  %v1111_v16 = vld [vmem:[%s1631_s0 + $0xd8] sm:$0xff]  }
  0x4a   :  { %v1028_v28 = vpack.c.bf16 %v514_v20, %v513_v19  ;;  %v261_v29 = vadd.f32 %v1216_v4, %v193_v21  ;;  %v763_v30 = vunpack.c.l.bf16 %v1107_v18  ;;  %v764_v31 = vunpack.c.h.bf16 %v1107_v18  ;;  %v1142_v21 = vld [vmem:[%s1634_s3 + $0xd8] sm:$0xff]  }
  0x4b   :  { %v515_v33 = vmax.f32 %v451_v24, 0.0  ;;  %v516_v34 = vmax.f32 %v452_v25, 0.0  ;;  %v262_v35 = vadd.f32 %v1216_v4, %v194_v26  ;;  %v891_v36 = vunpack.c.l.bf16 %v1138_v23 }
  0x4c   :  { %1166 = vst [vmem:[%s1635_s4 + $0xa0] sm:$0xff] %v1028_v28   ;;  %v453_v38 = vadd.f32 %v887_v22, %v261_v29  ;;  %v195_v39 = vmul.f32 %v1211_v1, %v763_v30  ;;  %v196_v40 = vmul.f32 %v1211_v1, %v764_v31  ;;  %v892_v41 = vunpack.c.h.bf16 %v1138_v23  ;;  %v1112_v30 = vld [vmem:[%s1631_s0 + $0xe0] sm:$0xff]  }
  0x4d   :  { %v1033_v42 = vpack.c.bf16 %v516_v34, %v515_v33  ;;  %v454_v43 = vadd.f32 %v888_v27, %v262_v35  ;;  %v767_v44 = vunpack.c.l.bf16 %v1108_v32  ;;  %v768_v45 = vunpack.c.h.bf16 %v1108_v32  ;;  %v1143_v35 = vld [vmem:[%s1634_s3 + $0xe0] sm:$0xff]  }
  0x4e   :  { %v517_v47 = vmax.f32 %v453_v38, 0.0  ;;  %v263_v48 = vadd.f32 %v1216_v4, %v195_v39  ;;  %v264_v49 = vadd.f32 %v1216_v4, %v196_v40  ;;  %v895_v50 = vunpack.c.l.bf16 %v1139_v37 }
  0x4f   :  { %1167 = vst [vmem:[%s1635_s4 + $0xa8] sm:$0xff] %v1033_v42   ;;  %v518_v52 = vmax.f32 %v454_v43, 0.0  ;;  %v197_v53 = vmul.f32 %v1211_v1, %v767_v44  ;;  %v198_v54 = vmul.f32 %v1211_v1, %v768_v45  ;;  %v896_v55 = vunpack.c.h.bf16 %v1139_v37  ;;  %v1113_v44 = vld [vmem:[%s1631_s0 + $0xe8] sm:$0xff]  }
  0x50   :  { %v455_v56 = vadd.f32 %v891_v36, %v263_v48  ;;  %v456_v57 = vadd.f32 %v892_v41, %v264_v49  ;;  %v771_v58 = vunpack.c.l.bf16 %v1109_v46  ;;  %v772_v59 = vunpack.c.h.bf16 %v1109_v46  ;;  %v1144_v49 = vld [vmem:[%s1634_s3 + $0xe8] sm:$0xff]  }
  0x51   :  { %v1038_v61 = vpack.c.bf16 %v518_v52, %v517_v47  ;;  %v265_v62 = vadd.f32 %v1216_v4, %v197_v53  ;;  %v266_v63 = vadd.f32 %v1216_v4, %v198_v54  ;;  %v899_v0 = vunpack.c.l.bf16 %v1140_v51 }
  0x52   :  { %v519_v2 = vmax.f32 %v455_v56, 0.0  ;;  %v520_v3 = vmax.f32 %v456_v57, 0.0  ;;  %v199_v5 = vmul.f32 %v1211_v1, %v771_v58  ;;  %v200_v6 = vmul.f32 %v1211_v1, %v772_v59  ;;  %v1114_v58 = vld [vmem:[%s1631_s0 + $0xf0] sm:$0xff]  }
  0x53   :  { %1168 = vst [vmem:[%s1635_s4 + $0xb0] sm:$0xff] %v1038_v61   ;;  %v457_v8 = vadd.f32 %v895_v50, %v265_v62  ;;  %v458_v9 = vadd.f32 %v896_v55, %v266_v63  ;;  %v900_v10 = vunpack.c.h.bf16 %v1140_v51  ;;  %v775_v11 = vunpack.c.l.bf16 %v1110_v60 }
  0x54   :  { %v1043_v12 = vpack.c.bf16 %v520_v3, %v519_v2  ;;  %v267_v13 = vadd.f32 %v1216_v4, %v199_v5  ;;  %v268_v14 = vadd.f32 %v1216_v4, %v200_v6  ;;  %v776_v15 = vunpack.c.h.bf16 %v1110_v60  ;;  %v1145_v5 = vld [vmem:[%s1634_s3 + $0xf0] sm:$0xff]  }
  0x55   :  { %v521_v17 = vmax.f32 %v457_v8, 0.0  ;;  %v522_v18 = vmax.f32 %v458_v9, 0.0  ;;  %v201_v19 = vmul.f32 %v1211_v1, %v775_v11  ;;  %v903_v20 = vunpack.c.l.bf16 %v1141_v7 }
  0x56   :  { %1169 = vst [vmem:[%s1635_s4 + $0xb8] sm:$0xff] %v1043_v12   ;;  %v459_v22 = vadd.f32 %v899_v0, %v267_v13  ;;  %v460_v23 = vadd.f32 %v900_v10, %v268_v14  ;;  %v202_v24 = vmul.f32 %v1211_v1, %v776_v15  ;;  %v904_v25 = vunpack.c.h.bf16 %v1141_v7  ;;  %v1115_v14 = vld [vmem:[%s1631_s0 + $0xf8] sm:$0xff]  }
  0x57   :  { %v1048_v26 = vpack.c.bf16 %v522_v18, %v521_v17  ;;  %v269_v27 = vadd.f32 %v1216_v4, %v201_v19  ;;  %v779_v28 = vunpack.c.l.bf16 %v1111_v16  ;;  %v780_v29 = vunpack.c.h.bf16 %v1111_v16  ;;  %v1146_v19 = vld [vmem:[%s1634_s3 + $0xf8] sm:$0xff]  }
  0x58   :  { %v523_v31 = vmax.f32 %v459_v22, 0.0  ;;  %v524_v32 = vmax.f32 %v460_v23, 0.0  ;;  %v270_v33 = vadd.f32 %v1216_v4, %v202_v24  ;;  %v907_v34 = vunpack.c.l.bf16 %v1142_v21 }
  0x59   :  { %1170 = vst [vmem:[%s1635_s4 + $0xc0] sm:$0xff] %v1048_v26   ;;  %v461_v36 = vadd.f32 %v903_v20, %v269_v27  ;;  %v203_v37 = vmul.f32 %v1211_v1, %v779_v28  ;;  %v204_v38 = vmul.f32 %v1211_v1, %v780_v29  ;;  %v908_v39 = vunpack.c.h.bf16 %v1142_v21 }
  0x5a   :  { %v1053_v40 = vpack.c.bf16 %v524_v32, %v523_v31  ;;  %v462_v41 = vadd.f32 %v904_v25, %v270_v33  ;;  %v783_v42 = vunpack.c.l.bf16 %v1112_v30  ;;  %v784_v43 = vunpack.c.h.bf16 %v1112_v30 }
  0x5b   :  { %v525_v45 = vmax.f32 %v461_v36, 0.0  ;;  %v271_v46 = vadd.f32 %v1216_v4, %v203_v37  ;;  %v272_v47 = vadd.f32 %v1216_v4, %v204_v38  ;;  %v911_v48 = vunpack.c.l.bf16 %v1143_v35 }
  0x5c   :  { %1171 = vst [vmem:[%s1635_s4 + $0xc8] sm:$0xff] %v1053_v40   ;;  %v526_v50 = vmax.f32 %v462_v41, 0.0  ;;  %v205_v51 = vmul.f32 %v1211_v1, %v783_v42  ;;  %v206_v52 = vmul.f32 %v1211_v1, %v784_v43  ;;  %v912_v53 = vunpack.c.h.bf16 %v1143_v35 }
  0x5d   :  { %v463_v54 = vadd.f32 %v907_v34, %v271_v46  ;;  %v464_v55 = vadd.f32 %v908_v39, %v272_v47  ;;  %v787_v56 = vunpack.c.l.bf16 %v1113_v44  ;;  %v788_v57 = vunpack.c.h.bf16 %v1113_v44 }
  0x5e   :  { %v1058_v59 = vpack.c.bf16 %v526_v50, %v525_v45  ;;  %v273_v60 = vadd.f32 %v1216_v4, %v205_v51  ;;  %v274_v61 = vadd.f32 %v1216_v4, %v206_v52  ;;  %v915_v62 = vunpack.c.l.bf16 %v1144_v49 }
  0x5f   :  { %v527_v63 = vmax.f32 %v463_v54, 0.0  ;;  %v528_v0 = vmax.f32 %v464_v55, 0.0  ;;  %v207_v2 = vmul.f32 %v1211_v1, %v787_v56  ;;  %v208_v3 = vmul.f32 %v1211_v1, %v788_v57 }
  0x60   :  { %1172 = vst [vmem:[%s1635_s4 + $0xd0] sm:$0xff] %v1058_v59   ;;  %v465_v6 = vadd.f32 %v911_v48, %v273_v60  ;;  %v466_v7 = vadd.f32 %v912_v53, %v274_v61  ;;  %v916_v8 = vunpack.c.h.bf16 %v1144_v49  ;;  %v791_v9 = vunpack.c.l.bf16 %v1114_v58 }
  0x61   :  { %v1063_v10 = vpack.c.bf16 %v528_v0, %v527_v63  ;;  %v275_v11 = vadd.f32 %v1216_v4, %v207_v2  ;;  %v276_v12 = vadd.f32 %v1216_v4, %v208_v3  ;;  %v792_v13 = vunpack.c.h.bf16 %v1114_v58 }
  0x62   :  { %v529_v15 = vmax.f32 %v465_v6, 0.0  ;;  %v530_v16 = vmax.f32 %v466_v7, 0.0  ;;  %v209_v17 = vmul.f32 %v1211_v1, %v791_v9  ;;  %v919_v18 = vunpack.c.l.bf16 %v1145_v5 }
  0x63   :  { %1173 = vst [vmem:[%s1635_s4 + $0xd8] sm:$0xff] %v1063_v10   ;;  %v467_v20 = vadd.f32 %v915_v62, %v275_v11  ;;  %v468_v21 = vadd.f32 %v916_v8, %v276_v12  ;;  %v210_v22 = vmul.f32 %v1211_v1, %v792_v13  ;;  %v920_v23 = vunpack.c.h.bf16 %v1145_v5 }
  0x64   :  { %v1068_v24 = vpack.c.bf16 %v530_v16, %v529_v15  ;;  %v277_v25 = vadd.f32 %v1216_v4, %v209_v17  ;;  %v795_v26 = vunpack.c.l.bf16 %v1115_v14  ;;  %v796_v27 = vunpack.c.h.bf16 %v1115_v14 }
  0x65   :  { %v531_v28 = vmax.f32 %v467_v20, 0.0  ;;  %v532_v29 = vmax.f32 %v468_v21, 0.0  ;;  %v278_v30 = vadd.f32 %v1216_v4, %v210_v22  ;;  %v923_v31 = vunpack.c.l.bf16 %v1146_v19 }
  0x66   :  { %1174 = vst [vmem:[%s1635_s4 + $0xe0] sm:$0xff] %v1068_v24   ;;  %v469_v32 = vadd.f32 %v919_v18, %v277_v25  ;;  %v211_v33 = vmul.f32 %v1211_v1, %v795_v26  ;;  %v212_v34 = vmul.f32 %v1211_v1, %v796_v27  ;;  %v924_v35 = vunpack.c.h.bf16 %v1146_v19 }
  0x67   :  { %v1073_v36 = vpack.c.bf16 %v532_v29, %v531_v28  ;;  %v470_v37 = vadd.f32 %v920_v23, %v278_v30 }
  0x68   :  { %v533_v38 = vmax.f32 %v469_v32, 0.0  ;;  %v279_v39 = vadd.f32 %v1216_v4, %v211_v33  ;;  %v280_v40 = vadd.f32 %v1216_v4, %v212_v34 }
  0x69   :  { %1175 = vst [vmem:[%s1635_s4 + $0xe8] sm:$0xff] %v1073_v36   ;;  %v534_v41 = vmax.f32 %v470_v37, 0.0 }
  0x6a   :  { %v471_v42 = vadd.f32 %v923_v31, %v279_v39  ;;  %v472_v43 = vadd.f32 %v924_v35, %v280_v40 }
  0x6b   :  { %v1078_v44 = vpack.c.bf16 %v534_v41, %v533_v38 }
  0x6c   :  { %v535_v45 = vmax.f32 %v471_v42, 0.0  ;;  %v536_v46 = vmax.f32 %v472_v43, 0.0 }
  0x6d   :  { %1176 = vst [vmem:[%s1635_s4 + $0xf0] sm:$0xff] %v1078_v44  }
  0x6e   :  { %v1083_v1 = vpack.c.bf16 %v536_v46, %v535_v45 }
  0x70   :  { %1177 = vst [vmem:[%s1635_s4 + $0xf8] sm:$0xff] %v1083_v1  }

</bundles_post_ra>
